<compile_context>
chip_gen: v7x
topology: tpu7x:2x2x1
jax: 0.10.0
libtpu: 0.0.40
codegen_flags: <defaults>
</compile_context>

<pallas_src>
import functools

import jax
import jax.numpy as jnp
from jax import lax
from jax.experimental import pallas as pl
from jax.experimental.pallas import tpu as pltpu


def _round_up(n, m):
    return ((n + m - 1) // m) * m


# ----------------------------------------------------------------------------
# Pallas kernel (one batch block per grid step)
# ----------------------------------------------------------------------------
def lstm_ae_kernel(
    x_ref,       # (T*Bb, F)   time-major input slab for this batch block
    wih_e_ref,   # (F, 4E)     encoder W_ih^T
    whh_e_ref,   # (E, 4E)     encoder W_hh^T
    b_e_ref,     # (1, 4E)     encoder b_ih + b_hh
    wih_d_ref,   # (E, 4E)     decoder W_ih^T
    whh_d_ref,   # (E, 4E)     decoder W_hh^T
    b_d_ref,     # (1, 4E)     decoder b_ih + b_hh
    wout_ref,    # (E, F)      output layer W^T
    bout_ref,    # (1, F)      output layer bias
    out_ref,     # (T*Bb, F)   time-major output slab
    xg_e_ref,    # scratch (T*Bb, 4E): precomputed encoder input projections
    hdec_ref,    # scratch (T*Bb, E) : staged decoder hidden states
    *,
    seq_len,
    block_batch,
    unroll,
    matmul_dtype,
):
    T, Bb = seq_len, block_batch
    E = whh_e_ref.shape[0]

    # Gate pre-scale vector: sigmoid(z) = 0.5*tanh(0.5*z) + 0.5, so scale the
    # i/f/o gate columns by 0.5 up front (gate layout [i | f | g | o]).
    # This is folded ONCE into W_ih / W_hh / bias, off the recurrence path.
    col = lax.broadcasted_iota(jnp.int32, (1, 4 * E), 1)
    s_vec = jnp.where((col >= 2 * E) & (col < 3 * E), 1.0, 0.5).astype(jnp.float32)

    # Recurrent weights: pre-scaled, cast to the MXU operand dtype (bf16 ->
    # single-pass MXU matmul on the serial critical path), hoisted out of loops.
    whh_e = (whh_e_ref[...] * s_vec).astype(matmul_dtype)
    whh_d = (whh_d_ref[...] * s_vec).astype(matmul_dtype)

    # --- encoder input projections for ALL timesteps in ONE matmul (bias and
    # gate pre-scale folded into the small weight/bias first, so no extra pass
    # over the big result). Off the recurrence critical path. ---
    wih_e_s = wih_e_ref[...] * s_vec
    b_e_s = b_e_ref[...] * s_vec
    xg_e_ref[...] = (
        jnp.dot(x_ref[...], wih_e_s, preferred_element_type=jnp.float32) + b_e_s
    )

    def lstm_step(xg_scaled, h, c, whh):
        # gates already carry the 0.5 pre-scale on the i/f/o lanes.
        gates = xg_scaled + jnp.dot(
            h.astype(matmul_dtype), whh, preferred_element_type=jnp.float32
        )
        tg = jnp.tanh(gates)                       # ONE EUP pass over (Bb, 4E)
        i_g = 0.5 * tg[:, 0 * E:1 * E] + 0.5       # sigmoid via tanh identity
        f_g = 0.5 * tg[:, 1 * E:2 * E] + 0.5
        g_g = tg[:, 2 * E:3 * E]                   # tanh(g) directly
        o_g = 0.5 * tg[:, 3 * E:4 * E] + 0.5
        c_new = f_g * c + i_g * g_g                # carries stay f32 (VPU-native)
        h_new = o_g * jnp.tanh(c_new)              # the only other EUP op/step
        return h_new, c_new

    h0 = jnp.zeros((Bb, E), jnp.float32)
    c0 = jnp.zeros((Bb, E), jnp.float32)

    # ---------------- encoder: one h @ W_hh dot per step ----------------
    def enc_body(t, carry):
        h, c = carry
        row = pl.multiple_of(t * Bb, Bb)           # Bb multiple of 8 -> aligned
        return lstm_step(xg_e_ref[pl.ds(row, Bb), :], h, c, whh_e)

    h_enc, _ = lax.fori_loop(0, T, enc_body, (h0, c0), unroll=unroll)

    # --- decoder input is h_enc every step: hoist projection (+bias, +scale) ---
    xg_d = (
        jnp.dot(h_enc, wih_d_ref[...] * s_vec, preferred_element_type=jnp.float32)
        + b_d_ref[...] * s_vec
    )

    # ---------------- decoder: one h @ W_hh dot per step ----------------
    def dec_body(t, carry):
        h, c = carry
        h, c = lstm_step(xg_d, h, c, whh_d)
        row = pl.multiple_of(t * Bb, Bb)
        hdec_ref[pl.ds(row, Bb), :] = h            # stage h; project after loop
        return (h, c)

    lax.fori_loop(0, T, dec_body, (h0, c0), unroll=unroll)

    # ---------------- deferred output projection: one matmul + bulk store ---
    out_ref[...] = (
        jnp.dot(hdec_ref[...], wout_ref[...], preferred_element_type=jnp.float32)
        + bout_ref[...]
    ).astype(out_ref.dtype)


# ----------------------------------------------------------------------------
# Wrapper: layout plumbing + pallas_call with a batch-block grid
# ----------------------------------------------------------------------------
@functools.partial(jax.jit, static_argnames=("use_bf16_recurrence",))
def lstm_autoencoder(x, params, use_bf16_recurrence=True):
    """x: (B, T, F) float32, batch-first like PyTorch. Returns (B, T, F)."""
    B, T, F = x.shape
    E = params["whh_e"].shape[1]

    # Batch block: as large as the MXU row dim (256) before adding grid steps;
    # multiple of 8 so every per-step slice/store is sublane aligned.
    Bb = min(256, _round_up(max(B, 8), 8))
    Bp = _round_up(max(B, 8), Bb)
    G = Bp // Bb

    # time-major, batch-padded, blocked: row = g*(T*Bb) + t*Bb + b_local
    x_tbf = jnp.transpose(x, (1, 0, 2)).astype(jnp.float32)       # (T, B, F)
    x_pad = jnp.pad(x_tbf, ((0, 0), (0, Bp - B), (0, 0)))         # (T, Bp, F)
    x_blk = x_pad.reshape(T, G, Bb, F).transpose(1, 0, 2, 3)      # (G, T, Bb, F)
    x_flat = x_blk.reshape(G * T * Bb, F)

    # Pre-transpose weights, combine biases (matches nn.LSTM / nn.Linear).
    wih_e_t = params["wih_e"].T.astype(jnp.float32)               # (F, 4E)
    whh_e_t = params["whh_e"].T.astype(jnp.float32)               # (E, 4E)
    b_e = (params["bih_e"] + params["bhh_e"]).reshape(1, 4 * E).astype(jnp.float32)
    wih_d_t = params["wih_d"].T.astype(jnp.float32)               # (E, 4E)
    whh_d_t = params["whh_d"].T.astype(jnp.float32)               # (E, 4E)
    b_d = (params["bih_d"] + params["bhh_d"]).reshape(1, 4 * E).astype(jnp.float32)
    wout_t = params["wout"].T.astype(jnp.float32)                 # (E, F)
    bout = params["bout"].reshape(1, F).astype(jnp.float32)

    matmul_dtype = jnp.bfloat16 if use_bf16_recurrence else jnp.float32
    kernel = functools.partial(
        lstm_ae_kernel,
        seq_len=T,
        block_batch=Bb,
        unroll=min(T, 8),                 # bounded unroll: no vreg spills at large T
        matmul_dtype=matmul_dtype,
    )

    full = lambda g: (0, 0)               # weights: same block every grid step
    grid_spec = pltpu.PrefetchScalarGridSpec(
        num_scalar_prefetch=0,
        grid=(G,),
        in_specs=[
            pl.BlockSpec((T * Bb, F), lambda g: (g, 0)),          # x slab
            pl.BlockSpec((F, 4 * E), full),                       # wih_e^T
            pl.BlockSpec((E, 4 * E), full),                       # whh_e^T
            pl.BlockSpec((1, 4 * E), full),                       # b_e
            pl.BlockSpec((E, 4 * E), full),                       # wih_d^T
            pl.BlockSpec((E, 4 * E), full),                       # whh_d^T
            pl.BlockSpec((1, 4 * E), full),                       # b_d
            pl.BlockSpec((E, F), full),                           # wout^T
            pl.BlockSpec((1, F), full),                           # bout
        ],
        out_specs=pl.BlockSpec((T * Bb, F), lambda g: (g, 0)),
        scratch_shapes=[
            pltpu.VMEM((T * Bb, 4 * E), jnp.float32),   # encoder input gates
            pltpu.VMEM((T * Bb, E), jnp.float32),       # staged decoder h's
        ],
    )

    # NOTE: at production T*Bb, also set vmem_limit_bytes in CompilerParams so
    # the per-block residency (double-buffered x/out + scratch) stays under the
    # scoped limit (64 MiB physical on v7x).
    out_flat = pl.pallas_call(
        kernel,
        out_shape=jax.ShapeDtypeStruct((G * T * Bb, F), jnp.float32),
        grid_spec=grid_spec,
        compiler_params=pltpu.CompilerParams(
            dimension_semantics=("parallel",),
        ),
    )(x_flat, wih_e_t, whh_e_t, b_e, wih_d_t, whh_d_t, b_d, wout_t, bout)

    out = (
        out_flat.reshape(G, T, Bb, F)
        .transpose(1, 0, 2, 3)
        .reshape(T, Bp, F)[:, :B, :]
    )
    return jnp.transpose(out, (1, 0, 2))                # back to (B, T, F)


# ----------------------------------------------------------------------------
# Pure-JAX reference (mirrors torch.nn.LSTM / nn.Linear semantics exactly)
# ----------------------------------------------------------------------------
def lstm_ref(x_seq, wih, whh, bih, bhh):
    B = x_seq.shape[0]
    E = whh.shape[1]
    h = jnp.zeros((B, E), jnp.float32)
    c = jnp.zeros((B, E), jnp.float32)
    outs = []
    for t in range(x_seq.shape[1]):
        g = x_seq[:, t, :] @ wih.T + bih + h @ whh.T + bhh
        i = jax.nn.sigmoid(g[:, 0 * E:1 * E])
        f = jax.nn.sigmoid(g[:, 1 * E:2 * E])
        gg = jnp.tanh(g[:, 2 * E:3 * E])
        o = jax.nn.sigmoid(g[:, 3 * E:4 * E])
        c = f * c + i * gg
        h = o * jnp.tanh(c)
        outs.append(h)
    return jnp.stack(outs, axis=1), h


def reference(x, params):
    T = x.shape[1]
    _, h_enc = lstm_ref(x, params["wih_e"], params["whh_e"],
                        params["bih_e"], params["bhh_e"])
    dec_in = jnp.repeat(h_enc[:, None, :], T, axis=1)        # (B, T, E)
    dec_out, _ = lstm_ref(dec_in, params["wih_d"], params["whh_d"],
                          params["bih_d"], params["bhh_d"])
    return dec_out @ params["wout"].T + params["bout"]


# ----------------------------------------------------------------------------
# Deterministic parameter init (PyTorch-style uniform(-1/sqrt(E), 1/sqrt(E)))
# ----------------------------------------------------------------------------
def init_params(key, n_features, embedding_dim):
    E, F = embedding_dim, n_features
    k = 1.0 / jnp.sqrt(E)
    keys = jax.random.split(key, 10)
    u = lambda kk, shape: jax.random.uniform(kk, shape, jnp.float32, -k, k)
    return {
        "wih_e": u(keys[0], (4 * E, F)),
        "whh_e": u(keys[1], (4 * E, E)),
        "bih_e": u(keys[2], (4 * E,)),
        "bhh_e": u(keys[3], (4 * E,)),
        "wih_d": u(keys[4], (4 * E, E)),
        "whh_d": u(keys[5], (4 * E, E)),
        "bih_d": u(keys[6], (4 * E,)),
        "bhh_d": u(keys[7], (4 * E,)),
        "wout": u(keys[8], (F, E)),
        "bout": u(keys[9], (F,)),
    }


if __name__ == "__main__":
    B, T, F, E = 4, 8, 8, 32   # batch, seq_len, n_features, embedding_dim

    key = jax.random.PRNGKey(0)
    kx, kp = jax.random.split(key)
    x = jax.random.normal(kx, (B, T, F), jnp.float32)
    params = init_params(kp, F, E)

    ref = reference(x, params)

    # f32 recurrence: tight check proving the semantics are exact.
    out_f32 = jax.block_until_ready(
        lstm_autoencoder(x, params, use_bf16_recurrence=False))
    assert out_f32.shape == (B, T, F)
    err32 = float(jnp.max(jnp.abs(out_f32 - ref)))
    assert err32 < 1e-4, err32

    # bf16 MXU-operand recurrence (default / fastest): looser drift tolerance.
    out_bf16 = jax.block_until_ready(lstm_autoencoder(x, params))
    assert out_bf16.shape == (B, T, F)
    err16 = float(jnp.max(jnp.abs(out_bf16 - ref)))
    assert err16 < 5e-2, err16

    print("KERNEL_OK")
</pallas_src>

<mosaic_0001>
module attributes {stable_mosaic.version = 11 : i64} {
  func.func @lstm_ae_kernel(%arg0: i32, %arg1: memref<64x8xf32, #tpu.memory_space<vmem>>, %arg2: memref<8x128xf32, #tpu.memory_space<vmem>>, %arg3: memref<32x128xf32, #tpu.memory_space<vmem>>, %arg4: memref<1x128xf32, #tpu.memory_space<vmem>>, %arg5: memref<32x128xf32, #tpu.memory_space<vmem>>, %arg6: memref<32x128xf32, #tpu.memory_space<vmem>>, %arg7: memref<1x128xf32, #tpu.memory_space<vmem>>, %arg8: memref<32x8xf32, #tpu.memory_space<vmem>>, %arg9: memref<1x8xf32, #tpu.memory_space<vmem>>, %arg10: memref<64x8xf32, #tpu.memory_space<vmem>>, %arg11: memref<64x128xf32, #tpu.memory_space<vmem>>, %arg12: memref<64x32xf32, #tpu.memory_space<vmem>>) attributes {dimension_semantics = [#tpu.dimension_semantics<parallel>], iteration_bounds = array<i64: 1>, scalar_prefetch = 0 : i64, scratch_operands = 2 : i64, tpu.core_type = #tpu.core_type<tc>, window_params = [{transform_indices = @transform_0, window_bounds = array<i64: 64, 8>}, {pipeline_mode = #tpu.pipeline_mode<synchronous>, transform_indices = @transform_1, window_bounds = array<i64: 8, 128>}, {pipeline_mode = #tpu.pipeline_mode<synchronous>, transform_indices = @transform_2, window_bounds = array<i64: 32, 128>}, {pipeline_mode = #tpu.pipeline_mode<synchronous>, transform_indices = @transform_3, window_bounds = array<i64: 1, 128>}, {pipeline_mode = #tpu.pipeline_mode<synchronous>, transform_indices = @transform_4, window_bounds = array<i64: 32, 128>}, {pipeline_mode = #tpu.pipeline_mode<synchronous>, transform_indices = @transform_5, window_bounds = array<i64: 32, 128>}, {pipeline_mode = #tpu.pipeline_mode<synchronous>, transform_indices = @transform_6, window_bounds = array<i64: 1, 128>}, {pipeline_mode = #tpu.pipeline_mode<synchronous>, transform_indices = @transform_7, window_bounds = array<i64: 32, 8>}, {pipeline_mode = #tpu.pipeline_mode<synchronous>, transform_indices = @transform_8, window_bounds = array<i64: 1, 8>}, {transform_indices = @transform_9, window_bounds = array<i64: 64, 8>}]} {
    %0 = tpu.iota {dimensions = array<i32: 1>} : vector<1x128xi32>
    %c64_i32 = arith.constant 64 : i32
    %1 = vector.broadcast %c64_i32 : i32 to vector<1x128xi32>
    %2 = arith.cmpi sge, %0, %1 : vector<1x128xi32>
    %c96_i32 = arith.constant 96 : i32
    %3 = vector.broadcast %c96_i32 : i32 to vector<1x128xi32>
    %4 = arith.cmpi slt, %0, %3 : vector<1x128xi32>
    %5 = arith.andi %2, %4 : vector<1x128xi1>
    %cst = arith.constant 1.000000e+00 : f32
    %cst_0 = arith.constant 5.000000e-01 : f32
    %6 = vector.broadcast %cst : f32 to vector<1x128xf32>
    %7 = vector.broadcast %cst_0 : f32 to vector<1x128xf32>
    %8 = arith.select %5, %6, %7 : vector<1x128xi1>, vector<1x128xf32>
    %c0 = arith.constant 0 : index
    %c0_1 = arith.constant 0 : index
    %9 = vector.load %arg3[%c0, %c0_1] : memref<32x128xf32, #tpu.memory_space<vmem>>, vector<32x128xf32>
    %10 = vector.broadcast %8 : vector<1x128xf32> to vector<32x128xf32>
    %11 = arith.mulf %9, %10 : vector<32x128xf32>
    %c0_2 = arith.constant 0 : index
    %c0_3 = arith.constant 0 : index
    %12 = vector.load %arg6[%c0_2, %c0_3] : memref<32x128xf32, #tpu.memory_space<vmem>>, vector<32x128xf32>
    %13 = vector.broadcast %8 : vector<1x128xf32> to vector<32x128xf32>
    %14 = arith.mulf %12, %13 : vector<32x128xf32>
    %c0_4 = arith.constant 0 : index
    %c0_5 = arith.constant 0 : index
    %15 = vector.load %arg2[%c0_4, %c0_5] : memref<8x128xf32, #tpu.memory_space<vmem>>, vector<8x128xf32>
    %16 = vector.broadcast %8 : vector<1x128xf32> to vector<8x128xf32>
    %17 = arith.mulf %15, %16 : vector<8x128xf32>
    %c0_6 = arith.constant 0 : index
    %c0_7 = arith.constant 0 : index
    %18 = vector.load %arg4[%c0_6, %c0_7] : memref<1x128xf32, #tpu.memory_space<vmem>>, vector<1x128xf32>
    %19 = arith.mulf %18, %8 : vector<1x128xf32>
    %c0_8 = arith.constant 0 : index
    %c0_9 = arith.constant 0 : index
    %20 = vector.load %arg1[%c0_8, %c0_9] : memref<64x8xf32, #tpu.memory_space<vmem>>, vector<64x8xf32>
    %cst_10 = arith.constant dense<0.000000e+00> : vector<64x128xf32>
    %21 = tpu.matmul %20, %17, %cst_10 {dimension_numbers = #tpu.dot_dimension_numbers<[1], [0], [0], [1], [0, 0, 1, 1], [], []>} : vector<64x8xf32>, vector<8x128xf32>, vector<64x128xf32> -> vector<64x128xf32>
    %22 = vector.broadcast %19 : vector<1x128xf32> to vector<64x128xf32>
    %23 = arith.addf %21, %22 : vector<64x128xf32>
    %c0_11 = arith.constant 0 : index
    %c0_12 = arith.constant 0 : index
    %24 = vector.load %arg11[%c0_11, %c0_12] : memref<64x128xf32, #tpu.memory_space<vmem>>, vector<64x128xf32>
    tpu.vector_store %arg11[%c0_11, %c0_12], %23 {strides = array<i32>} : memref<64x128xf32, #tpu.memory_space<vmem>>, vector<64x128xf32>,
    %cst_13 = arith.constant 0.000000e+00 : f32
    %25 = vector.broadcast %cst_13 : f32 to vector<8x32xf32>
    %cst_14 = arith.constant 0.000000e+00 : f32
    %26 = vector.broadcast %cst_14 : f32 to vector<8x32xf32>
    %c0_i32 = arith.constant 0 : i32
    %c8_i32 = arith.constant 8 : i32
    %27 = arith.muli %c0_i32, %c8_i32 : i32
    %28 = tpu.assume_multiple %27, 8 : i32
    %29 = arith.index_cast %28 : i32 to index
    %c0_15 = arith.constant 0 : index
    %30 = vector.load %arg11[%29, %c0_15] : memref<64x128xf32, #tpu.memory_space<vmem>>, vector<8x128xf32>
    %cst_16 = arith.constant dense<0.000000e+00> : vector<8x128xf32>
    %31 = tpu.matmul %25, %11, %cst_16 {dimension_numbers = #tpu.dot_dimension_numbers<[1], [0], [0], [1], [0, 0, 1, 1], [], []>} : vector<8x32xf32>, vector<32x128xf32>, vector<8x128xf32> -> vector<8x128xf32>
    %32 = arith.addf %30, %31 : vector<8x128xf32>
    %33 = math.tanh %32 : vector<8x128xf32>
    %34 = vector.extract_strided_slice %33 {offsets = [0, 0], sizes = [8, 32], strides = [1, 1]} : vector<8x128xf32> to vector<8x32xf32>
    %cst_17 = arith.constant 5.000000e-01 : f32
    %35 = vector.broadcast %cst_17 : f32 to vector<8x32xf32>
    %36 = arith.mulf %35, %34 : vector<8x32xf32>
    %cst_18 = arith.constant 5.000000e-01 : f32
    %37 = vector.broadcast %cst_18 : f32 to vector<8x32xf32>
    %38 = arith.addf %36, %37 : vector<8x32xf32>
    %39 = vector.extract_strided_slice %33 {offsets = [0, 32], sizes = [8, 32], strides = [1, 1]} : vector<8x128xf32> to vector<8x32xf32>
    %cst_19 = arith.constant 5.000000e-01 : f32
    %40 = vector.broadcast %cst_19 : f32 to vector<8x32xf32>
    %41 = arith.mulf %40, %39 : vector<8x32xf32>
    %cst_20 = arith.constant 5.000000e-01 : f32
    %42 = vector.broadcast %cst_20 : f32 to vector<8x32xf32>
    %43 = arith.addf %41, %42 : vector<8x32xf32>
    %44 = vector.extract_strided_slice %33 {offsets = [0, 64], sizes = [8, 32], strides = [1, 1]} : vector<8x128xf32> to vector<8x32xf32>
    %45 = vector.extract_strided_slice %33 {offsets = [0, 96], sizes = [8, 32], strides = [1, 1]} : vector<8x128xf32> to vector<8x32xf32>
    %cst_21 = arith.constant 5.000000e-01 : f32
    %46 = vector.broadcast %cst_21 : f32 to vector<8x32xf32>
    %47 = arith.mulf %46, %45 : vector<8x32xf32>
    %cst_22 = arith.constant 5.000000e-01 : f32
    %48 = vector.broadcast %cst_22 : f32 to vector<8x32xf32>
    %49 = arith.addf %47, %48 : vector<8x32xf32>
    %50 = arith.mulf %43, %26 : vector<8x32xf32>
    %51 = arith.mulf %38, %44 : vector<8x32xf32>
    %52 = arith.addf %50, %51 : vector<8x32xf32>
    %53 = math.tanh %52 : vector<8x32xf32>
    %54 = arith.mulf %49, %53 : vector<8x32xf32>
    %c1_i32 = arith.constant 1 : i32
    %c8_i32_23 = arith.constant 8 : i32
    %55 = arith.muli %c1_i32, %c8_i32_23 : i32
    %56 = tpu.assume_multiple %55, 8 : i32
    %57 = arith.index_cast %56 : i32 to index
    %c0_24 = arith.constant 0 : index
    %58 = vector.load %arg11[%57, %c0_24] : memref<64x128xf32, #tpu.memory_space<vmem>>, vector<8x128xf32>
    %cst_25 = arith.constant dense<0.000000e+00> : vector<8x128xf32>
    %59 = tpu.matmul %54, %11, %cst_25 {dimension_numbers = #tpu.dot_dimension_numbers<[1], [0], [0], [1], [0, 0, 1, 1], [], []>} : vector<8x32xf32>, vector<32x128xf32>, vector<8x128xf32> -> vector<8x128xf32>
    %60 = arith.addf %58, %59 : vector<8x128xf32>
    %61 = math.tanh %60 : vector<8x128xf32>
    %62 = vector.extract_strided_slice %61 {offsets = [0, 0], sizes = [8, 32], strides = [1, 1]} : vector<8x128xf32> to vector<8x32xf32>
    %cst_26 = arith.constant 5.000000e-01 : f32
    %63 = vector.broadcast %cst_26 : f32 to vector<8x32xf32>
    %64 = arith.mulf %63, %62 : vector<8x32xf32>
    %cst_27 = arith.constant 5.000000e-01 : f32
    %65 = vector.broadcast %cst_27 : f32 to vector<8x32xf32>
    %66 = arith.addf %64, %65 : vector<8x32xf32>
    %67 = vector.extract_strided_slice %61 {offsets = [0, 32], sizes = [8, 32], strides = [1, 1]} : vector<8x128xf32> to vector<8x32xf32>
    %cst_28 = arith.constant 5.000000e-01 : f32
    %68 = vector.broadcast %cst_28 : f32 to vector<8x32xf32>
    %69 = arith.mulf %68, %67 : vector<8x32xf32>
    %cst_29 = arith.constant 5.000000e-01 : f32
    %70 = vector.broadcast %cst_29 : f32 to vector<8x32xf32>
    %71 = arith.addf %69, %70 : vector<8x32xf32>
    %72 = vector.extract_strided_slice %61 {offsets = [0, 64], sizes = [8, 32], strides = [1, 1]} : vector<8x128xf32> to vector<8x32xf32>
    %73 = vector.extract_strided_slice %61 {offsets = [0, 96], sizes = [8, 32], strides = [1, 1]} : vector<8x128xf32> to vector<8x32xf32>
    %cst_30 = arith.constant 5.000000e-01 : f32
    %74 = vector.broadcast %cst_30 : f32 to vector<8x32xf32>
    %75 = arith.mulf %74, %73 : vector<8x32xf32>
    %cst_31 = arith.constant 5.000000e-01 : f32
    %76 = vector.broadcast %cst_31 : f32 to vector<8x32xf32>
    %77 = arith.addf %75, %76 : vector<8x32xf32>
    %78 = arith.mulf %71, %52 : vector<8x32xf32>
    %79 = arith.mulf %66, %72 : vector<8x32xf32>
    %80 = arith.addf %78, %79 : vector<8x32xf32>
    %81 = math.tanh %80 : vector<8x32xf32>
    %82 = arith.mulf %77, %81 : vector<8x32xf32>
    %c2_i32 = arith.constant 2 : i32
    %c8_i32_32 = arith.constant 8 : i32
    %83 = arith.muli %c2_i32, %c8_i32_32 : i32
    %84 = tpu.assume_multiple %83, 8 : i32
    %85 = arith.index_cast %84 : i32 to index
    %c0_33 = arith.constant 0 : index
    %86 = vector.load %arg11[%85, %c0_33] : memref<64x128xf32, #tpu.memory_space<vmem>>, vector<8x128xf32>
    %cst_34 = arith.constant dense<0.000000e+00> : vector<8x128xf32>
    %87 = tpu.matmul %82, %11, %cst_34 {dimension_numbers = #tpu.dot_dimension_numbers<[1], [0], [0], [1], [0, 0, 1, 1], [], []>} : vector<8x32xf32>, vector<32x128xf32>, vector<8x128xf32> -> vector<8x128xf32>
    %88 = arith.addf %86, %87 : vector<8x128xf32>
    %89 = math.tanh %88 : vector<8x128xf32>
    %90 = vector.extract_strided_slice %89 {offsets = [0, 0], sizes = [8, 32], strides = [1, 1]} : vector<8x128xf32> to vector<8x32xf32>
    %cst_35 = arith.constant 5.000000e-01 : f32
    %91 = vector.broadcast %cst_35 : f32 to vector<8x32xf32>
    %92 = arith.mulf %91, %90 : vector<8x32xf32>
    %cst_36 = arith.constant 5.000000e-01 : f32
    %93 = vector.broadcast %cst_36 : f32 to vector<8x32xf32>
    %94 = arith.addf %92, %93 : vector<8x32xf32>
    %95 = vector.extract_strided_slice %89 {offsets = [0, 32], sizes = [8, 32], strides = [1, 1]} : vector<8x128xf32> to vector<8x32xf32>
    %cst_37 = arith.constant 5.000000e-01 : f32
    %96 = vector.broadcast %cst_37 : f32 to vector<8x32xf32>
    %97 = arith.mulf %96, %95 : vector<8x32xf32>
    %cst_38 = arith.constant 5.000000e-01 : f32
    %98 = vector.broadcast %cst_38 : f32 to vector<8x32xf32>
    %99 = arith.addf %97, %98 : vector<8x32xf32>
    %100 = vector.extract_strided_slice %89 {offsets = [0, 64], sizes = [8, 32], strides = [1, 1]} : vector<8x128xf32> to vector<8x32xf32>
    %101 = vector.extract_strided_slice %89 {offsets = [0, 96], sizes = [8, 32], strides = [1, 1]} : vector<8x128xf32> to vector<8x32xf32>
    %cst_39 = arith.constant 5.000000e-01 : f32
    %102 = vector.broadcast %cst_39 : f32 to vector<8x32xf32>
    %103 = arith.mulf %102, %101 : vector<8x32xf32>
    %cst_40 = arith.constant 5.000000e-01 : f32
    %104 = vector.broadcast %cst_40 : f32 to vector<8x32xf32>
    %105 = arith.addf %103, %104 : vector<8x32xf32>
    %106 = arith.mulf %99, %80 : vector<8x32xf32>
    %107 = arith.mulf %94, %100 : vector<8x32xf32>
    %108 = arith.addf %106, %107 : vector<8x32xf32>
    %109 = math.tanh %108 : vector<8x32xf32>
    %110 = arith.mulf %105, %109 : vector<8x32xf32>
    %c3_i32 = arith.constant 3 : i32
    %c8_i32_41 = arith.constant 8 : i32
    %111 = arith.muli %c3_i32, %c8_i32_41 : i32
    %112 = tpu.assume_multiple %111, 8 : i32
    %113 = arith.index_cast %112 : i32 to index
    %c0_42 = arith.constant 0 : index
    %114 = vector.load %arg11[%113, %c0_42] : memref<64x128xf32, #tpu.memory_space<vmem>>, vector<8x128xf32>
    %cst_43 = arith.constant dense<0.000000e+00> : vector<8x128xf32>
    %115 = tpu.matmul %110, %11, %cst_43 {dimension_numbers = #tpu.dot_dimension_numbers<[1], [0], [0], [1], [0, 0, 1, 1], [], []>} : vector<8x32xf32>, vector<32x128xf32>, vector<8x128xf32> -> vector<8x128xf32>
    %116 = arith.addf %114, %115 : vector<8x128xf32>
    %117 = math.tanh %116 : vector<8x128xf32>
    %118 = vector.extract_strided_slice %117 {offsets = [0, 0], sizes = [8, 32], strides = [1, 1]} : vector<8x128xf32> to vector<8x32xf32>
    %cst_44 = arith.constant 5.000000e-01 : f32
    %119 = vector.broadcast %cst_44 : f32 to vector<8x32xf32>
    %120 = arith.mulf %119, %118 : vector<8x32xf32>
    %cst_45 = arith.constant 5.000000e-01 : f32
    %121 = vector.broadcast %cst_45 : f32 to vector<8x32xf32>
    %122 = arith.addf %120, %121 : vector<8x32xf32>
    %123 = vector.extract_strided_slice %117 {offsets = [0, 32], sizes = [8, 32], strides = [1, 1]} : vector<8x128xf32> to vector<8x32xf32>
    %cst_46 = arith.constant 5.000000e-01 : f32
    %124 = vector.broadcast %cst_46 : f32 to vector<8x32xf32>
    %125 = arith.mulf %124, %123 : vector<8x32xf32>
    %cst_47 = arith.constant 5.000000e-01 : f32
    %126 = vector.broadcast %cst_47 : f32 to vector<8x32xf32>
    %127 = arith.addf %125, %126 : vector<8x32xf32>
    %128 = vector.extract_strided_slice %117 {offsets = [0, 64], sizes = [8, 32], strides = [1, 1]} : vector<8x128xf32> to vector<8x32xf32>
    %129 = vector.extract_strided_slice %117 {offsets = [0, 96], sizes = [8, 32], strides = [1, 1]} : vector<8x128xf32> to vector<8x32xf32>
    %cst_48 = arith.constant 5.000000e-01 : f32
    %130 = vector.broadcast %cst_48 : f32 to vector<8x32xf32>
    %131 = arith.mulf %130, %129 : vector<8x32xf32>
    %cst_49 = arith.constant 5.000000e-01 : f32
    %132 = vector.broadcast %cst_49 : f32 to vector<8x32xf32>
    %133 = arith.addf %131, %132 : vector<8x32xf32>
    %134 = arith.mulf %127, %108 : vector<8x32xf32>
    %135 = arith.mulf %122, %128 : vector<8x32xf32>
    %136 = arith.addf %134, %135 : vector<8x32xf32>
    %137 = math.tanh %136 : vector<8x32xf32>
    %138 = arith.mulf %133, %137 : vector<8x32xf32>
    %c4_i32 = arith.constant 4 : i32
    %c8_i32_50 = arith.constant 8 : i32
    %139 = arith.muli %c4_i32, %c8_i32_50 : i32
    %140 = tpu.assume_multiple %139, 8 : i32
    %141 = arith.index_cast %140 : i32 to index
    %c0_51 = arith.constant 0 : index
    %142 = vector.load %arg11[%141, %c0_51] : memref<64x128xf32, #tpu.memory_space<vmem>>, vector<8x128xf32>
    %cst_52 = arith.constant dense<0.000000e+00> : vector<8x128xf32>
    %143 = tpu.matmul %138, %11, %cst_52 {dimension_numbers = #tpu.dot_dimension_numbers<[1], [0], [0], [1], [0, 0, 1, 1], [], []>} : vector<8x32xf32>, vector<32x128xf32>, vector<8x128xf32> -> vector<8x128xf32>
    %144 = arith.addf %142, %143 : vector<8x128xf32>
    %145 = math.tanh %144 : vector<8x128xf32>
    %146 = vector.extract_strided_slice %145 {offsets = [0, 0], sizes = [8, 32], strides = [1, 1]} : vector<8x128xf32> to vector<8x32xf32>
    %cst_53 = arith.constant 5.000000e-01 : f32
    %147 = vector.broadcast %cst_53 : f32 to vector<8x32xf32>
    %148 = arith.mulf %147, %146 : vector<8x32xf32>
    %cst_54 = arith.constant 5.000000e-01 : f32
    %149 = vector.broadcast %cst_54 : f32 to vector<8x32xf32>
    %150 = arith.addf %148, %149 : vector<8x32xf32>
    %151 = vector.extract_strided_slice %145 {offsets = [0, 32], sizes = [8, 32], strides = [1, 1]} : vector<8x128xf32> to vector<8x32xf32>
    %cst_55 = arith.constant 5.000000e-01 : f32
    %152 = vector.broadcast %cst_55 : f32 to vector<8x32xf32>
    %153 = arith.mulf %152, %151 : vector<8x32xf32>
    %cst_56 = arith.constant 5.000000e-01 : f32
    %154 = vector.broadcast %cst_56 : f32 to vector<8x32xf32>
    %155 = arith.addf %153, %154 : vector<8x32xf32>
    %156 = vector.extract_strided_slice %145 {offsets = [0, 64], sizes = [8, 32], strides = [1, 1]} : vector<8x128xf32> to vector<8x32xf32>
    %157 = vector.extract_strided_slice %145 {offsets = [0, 96], sizes = [8, 32], strides = [1, 1]} : vector<8x128xf32> to vector<8x32xf32>
    %cst_57 = arith.constant 5.000000e-01 : f32
    %158 = vector.broadcast %cst_57 : f32 to vector<8x32xf32>
    %159 = arith.mulf %158, %157 : vector<8x32xf32>
    %cst_58 = arith.constant 5.000000e-01 : f32
    %160 = vector.broadcast %cst_58 : f32 to vector<8x32xf32>
    %161 = arith.addf %159, %160 : vector<8x32xf32>
    %162 = arith.mulf %155, %136 : vector<8x32xf32>
    %163 = arith.mulf %150, %156 : vector<8x32xf32>
    %164 = arith.addf %162, %163 : vector<8x32xf32>
    %165 = math.tanh %164 : vector<8x32xf32>
    %166 = arith.mulf %161, %165 : vector<8x32xf32>
    %c5_i32 = arith.constant 5 : i32
    %c8_i32_59 = arith.constant 8 : i32
    %167 = arith.muli %c5_i32, %c8_i32_59 : i32
    %168 = tpu.assume_multiple %167, 8 : i32
    %169 = arith.index_cast %168 : i32 to index
    %c0_60 = arith.constant 0 : index
    %170 = vector.load %arg11[%169, %c0_60] : memref<64x128xf32, #tpu.memory_space<vmem>>, vector<8x128xf32>
    %cst_61 = arith.constant dense<0.000000e+00> : vector<8x128xf32>
    %171 = tpu.matmul %166, %11, %cst_61 {dimension_numbers = #tpu.dot_dimension_numbers<[1], [0], [0], [1], [0, 0, 1, 1], [], []>} : vector<8x32xf32>, vector<32x128xf32>, vector<8x128xf32> -> vector<8x128xf32>
    %172 = arith.addf %170, %171 : vector<8x128xf32>
    %173 = math.tanh %172 : vector<8x128xf32>
    %174 = vector.extract_strided_slice %173 {offsets = [0, 0], sizes = [8, 32], strides = [1, 1]} : vector<8x128xf32> to vector<8x32xf32>
    %cst_62 = arith.constant 5.000000e-01 : f32
    %175 = vector.broadcast %cst_62 : f32 to vector<8x32xf32>
    %176 = arith.mulf %175, %174 : vector<8x32xf32>
    %cst_63 = arith.constant 5.000000e-01 : f32
    %177 = vector.broadcast %cst_63 : f32 to vector<8x32xf32>
    %178 = arith.addf %176, %177 : vector<8x32xf32>
    %179 = vector.extract_strided_slice %173 {offsets = [0, 32], sizes = [8, 32], strides = [1, 1]} : vector<8x128xf32> to vector<8x32xf32>
    %cst_64 = arith.constant 5.000000e-01 : f32
    %180 = vector.broadcast %cst_64 : f32 to vector<8x32xf32>
    %181 = arith.mulf %180, %179 : vector<8x32xf32>
    %cst_65 = arith.constant 5.000000e-01 : f32
    %182 = vector.broadcast %cst_65 : f32 to vector<8x32xf32>
    %183 = arith.addf %181, %182 : vector<8x32xf32>
    %184 = vector.extract_strided_slice %173 {offsets = [0, 64], sizes = [8, 32], strides = [1, 1]} : vector<8x128xf32> to vector<8x32xf32>
    %185 = vector.extract_strided_slice %173 {offsets = [0, 96], sizes = [8, 32], strides = [1, 1]} : vector<8x128xf32> to vector<8x32xf32>
    %cst_66 = arith.constant 5.000000e-01 : f32
    %186 = vector.broadcast %cst_66 : f32 to vector<8x32xf32>
    %187 = arith.mulf %186, %185 : vector<8x32xf32>
    %cst_67 = arith.constant 5.000000e-01 : f32
    %188 = vector.broadcast %cst_67 : f32 to vector<8x32xf32>
    %189 = arith.addf %187, %188 : vector<8x32xf32>
    %190 = arith.mulf %183, %164 : vector<8x32xf32>
    %191 = arith.mulf %178, %184 : vector<8x32xf32>
    %192 = arith.addf %190, %191 : vector<8x32xf32>
    %193 = math.tanh %192 : vector<8x32xf32>
    %194 = arith.mulf %189, %193 : vector<8x32xf32>
    %c6_i32 = arith.constant 6 : i32
    %c8_i32_68 = arith.constant 8 : i32
    %195 = arith.muli %c6_i32, %c8_i32_68 : i32
    %196 = tpu.assume_multiple %195, 8 : i32
    %197 = arith.index_cast %196 : i32 to index
    %c0_69 = arith.constant 0 : index
    %198 = vector.load %arg11[%197, %c0_69] : memref<64x128xf32, #tpu.memory_space<vmem>>, vector<8x128xf32>
    %cst_70 = arith.constant dense<0.000000e+00> : vector<8x128xf32>
    %199 = tpu.matmul %194, %11, %cst_70 {dimension_numbers = #tpu.dot_dimension_numbers<[1], [0], [0], [1], [0, 0, 1, 1], [], []>} : vector<8x32xf32>, vector<32x128xf32>, vector<8x128xf32> -> vector<8x128xf32>
    %200 = arith.addf %198, %199 : vector<8x128xf32>
    %201 = math.tanh %200 : vector<8x128xf32>
    %202 = vector.extract_strided_slice %201 {offsets = [0, 0], sizes = [8, 32], strides = [1, 1]} : vector<8x128xf32> to vector<8x32xf32>
    %cst_71 = arith.constant 5.000000e-01 : f32
    %203 = vector.broadcast %cst_71 : f32 to vector<8x32xf32>
    %204 = arith.mulf %203, %202 : vector<8x32xf32>
    %cst_72 = arith.constant 5.000000e-01 : f32
    %205 = vector.broadcast %cst_72 : f32 to vector<8x32xf32>
    %206 = arith.addf %204, %205 : vector<8x32xf32>
    %207 = vector.extract_strided_slice %201 {offsets = [0, 32], sizes = [8, 32], strides = [1, 1]} : vector<8x128xf32> to vector<8x32xf32>
    %cst_73 = arith.constant 5.000000e-01 : f32
    %208 = vector.broadcast %cst_73 : f32 to vector<8x32xf32>
    %209 = arith.mulf %208, %207 : vector<8x32xf32>
    %cst_74 = arith.constant 5.000000e-01 : f32
    %210 = vector.broadcast %cst_74 : f32 to vector<8x32xf32>
    %211 = arith.addf %209, %210 : vector<8x32xf32>
    %212 = vector.extract_strided_slice %201 {offsets = [0, 64], sizes = [8, 32], strides = [1, 1]} : vector<8x128xf32> to vector<8x32xf32>
    %213 = vector.extract_strided_slice %201 {offsets = [0, 96], sizes = [8, 32], strides = [1, 1]} : vector<8x128xf32> to vector<8x32xf32>
    %cst_75 = arith.constant 5.000000e-01 : f32
    %214 = vector.broadcast %cst_75 : f32 to vector<8x32xf32>
    %215 = arith.mulf %214, %213 : vector<8x32xf32>
    %cst_76 = arith.constant 5.000000e-01 : f32
    %216 = vector.broadcast %cst_76 : f32 to vector<8x32xf32>
    %217 = arith.addf %215, %216 : vector<8x32xf32>
    %218 = arith.mulf %211, %192 : vector<8x32xf32>
    %219 = arith.mulf %206, %212 : vector<8x32xf32>
    %220 = arith.addf %218, %219 : vector<8x32xf32>
    %221 = math.tanh %220 : vector<8x32xf32>
    %222 = arith.mulf %217, %221 : vector<8x32xf32>
    %c7_i32 = arith.constant 7 : i32
    %c8_i32_77 = arith.constant 8 : i32
    %223 = arith.muli %c7_i32, %c8_i32_77 : i32
    %224 = tpu.assume_multiple %223, 8 : i32
    %225 = arith.index_cast %224 : i32 to index
    %c0_78 = arith.constant 0 : index
    %226 = vector.load %arg11[%225, %c0_78] : memref<64x128xf32, #tpu.memory_space<vmem>>, vector<8x128xf32>
    %cst_79 = arith.constant dense<0.000000e+00> : vector<8x128xf32>
    %227 = tpu.matmul %222, %11, %cst_79 {dimension_numbers = #tpu.dot_dimension_numbers<[1], [0], [0], [1], [0, 0, 1, 1], [], []>} : vector<8x32xf32>, vector<32x128xf32>, vector<8x128xf32> -> vector<8x128xf32>
    %228 = arith.addf %226, %227 : vector<8x128xf32>
    %229 = math.tanh %228 : vector<8x128xf32>
    %230 = vector.extract_strided_slice %229 {offsets = [0, 0], sizes = [8, 32], strides = [1, 1]} : vector<8x128xf32> to vector<8x32xf32>
    %cst_80 = arith.constant 5.000000e-01 : f32
    %231 = vector.broadcast %cst_80 : f32 to vector<8x32xf32>
    %232 = arith.mulf %231, %230 : vector<8x32xf32>
    %cst_81 = arith.constant 5.000000e-01 : f32
    %233 = vector.broadcast %cst_81 : f32 to vector<8x32xf32>
    %234 = arith.addf %232, %233 : vector<8x32xf32>
    %235 = vector.extract_strided_slice %229 {offsets = [0, 32], sizes = [8, 32], strides = [1, 1]} : vector<8x128xf32> to vector<8x32xf32>
    %cst_82 = arith.constant 5.000000e-01 : f32
    %236 = vector.broadcast %cst_82 : f32 to vector<8x32xf32>
    %237 = arith.mulf %236, %235 : vector<8x32xf32>
    %cst_83 = arith.constant 5.000000e-01 : f32
    %238 = vector.broadcast %cst_83 : f32 to vector<8x32xf32>
    %239 = arith.addf %237, %238 : vector<8x32xf32>
    %240 = vector.extract_strided_slice %229 {offsets = [0, 64], sizes = [8, 32], strides = [1, 1]} : vector<8x128xf32> to vector<8x32xf32>
    %241 = vector.extract_strided_slice %229 {offsets = [0, 96], sizes = [8, 32], strides = [1, 1]} : vector<8x128xf32> to vector<8x32xf32>
    %cst_84 = arith.constant 5.000000e-01 : f32
    %242 = vector.broadcast %cst_84 : f32 to vector<8x32xf32>
    %243 = arith.mulf %242, %241 : vector<8x32xf32>
    %cst_85 = arith.constant 5.000000e-01 : f32
    %244 = vector.broadcast %cst_85 : f32 to vector<8x32xf32>
    %245 = arith.addf %243, %244 : vector<8x32xf32>
    %246 = arith.mulf %239, %220 : vector<8x32xf32>
    %247 = arith.mulf %234, %240 : vector<8x32xf32>
    %248 = arith.addf %246, %247 : vector<8x32xf32>
    %249 = math.tanh %248 : vector<8x32xf32>
    %250 = arith.mulf %245, %249 : vector<8x32xf32>
    %c8_i32_86 = arith.constant 8 : i32
    %c0_87 = arith.constant 0 : index
    %c0_88 = arith.constant 0 : index
    %251 = vector.load %arg5[%c0_87, %c0_88] : memref<32x128xf32, #tpu.memory_space<vmem>>, vector<32x128xf32>
    %252 = vector.broadcast %8 : vector<1x128xf32> to vector<32x128xf32>
    %253 = arith.mulf %251, %252 : vector<32x128xf32>
    %cst_89 = arith.constant dense<0.000000e+00> : vector<8x128xf32>
    %254 = tpu.matmul %250, %253, %cst_89 {dimension_numbers = #tpu.dot_dimension_numbers<[1], [0], [0], [1], [0, 0, 1, 1], [], []>} : vector<8x32xf32>, vector<32x128xf32>, vector<8x128xf32> -> vector<8x128xf32>
    %c0_90 = arith.constant 0 : index
    %c0_91 = arith.constant 0 : index
    %255 = vector.load %arg7[%c0_90, %c0_91] : memref<1x128xf32, #tpu.memory_space<vmem>>, vector<1x128xf32>
    %256 = arith.mulf %255, %8 : vector<1x128xf32>
    %257 = vector.broadcast %256 : vector<1x128xf32> to vector<8x128xf32>
    %258 = arith.addf %254, %257 : vector<8x128xf32>
    %c0_i32_92 = arith.constant 0 : i32
    %cst_93 = arith.constant dense<0.000000e+00> : vector<8x128xf32>
    %259 = tpu.matmul %25, %14, %cst_93 {dimension_numbers = #tpu.dot_dimension_numbers<[1], [0], [0], [1], [0, 0, 1, 1], [], []>} : vector<8x32xf32>, vector<32x128xf32>, vector<8x128xf32> -> vector<8x128xf32>
    %260 = arith.addf %258, %259 : vector<8x128xf32>
    %261 = math.tanh %260 : vector<8x128xf32>
    %262 = vector.extract_strided_slice %261 {offsets = [0, 0], sizes = [8, 32], strides = [1, 1]} : vector<8x128xf32> to vector<8x32xf32>
    %cst_94 = arith.constant 5.000000e-01 : f32
    %263 = vector.broadcast %cst_94 : f32 to vector<8x32xf32>
    %264 = arith.mulf %263, %262 : vector<8x32xf32>
    %cst_95 = arith.constant 5.000000e-01 : f32
    %265 = vector.broadcast %cst_95 : f32 to vector<8x32xf32>
    %266 = arith.addf %264, %265 : vector<8x32xf32>
    %267 = vector.extract_strided_slice %261 {offsets = [0, 32], sizes = [8, 32], strides = [1, 1]} : vector<8x128xf32> to vector<8x32xf32>
    %cst_96 = arith.constant 5.000000e-01 : f32
    %268 = vector.broadcast %cst_96 : f32 to vector<8x32xf32>
    %269 = arith.mulf %268, %267 : vector<8x32xf32>
    %cst_97 = arith.constant 5.000000e-01 : f32
    %270 = vector.broadcast %cst_97 : f32 to vector<8x32xf32>
    %271 = arith.addf %269, %270 : vector<8x32xf32>
    %272 = vector.extract_strided_slice %261 {offsets = [0, 64], sizes = [8, 32], strides = [1, 1]} : vector<8x128xf32> to vector<8x32xf32>
    %273 = vector.extract_strided_slice %261 {offsets = [0, 96], sizes = [8, 32], strides = [1, 1]} : vector<8x128xf32> to vector<8x32xf32>
    %cst_98 = arith.constant 5.000000e-01 : f32
    %274 = vector.broadcast %cst_98 : f32 to vector<8x32xf32>
    %275 = arith.mulf %274, %273 : vector<8x32xf32>
    %cst_99 = arith.constant 5.000000e-01 : f32
    %276 = vector.broadcast %cst_99 : f32 to vector<8x32xf32>
    %277 = arith.addf %275, %276 : vector<8x32xf32>
    %278 = arith.mulf %271, %26 : vector<8x32xf32>
    %279 = arith.mulf %266, %272 : vector<8x32xf32>
    %280 = arith.addf %278, %279 : vector<8x32xf32>
    %281 = math.tanh %280 : vector<8x32xf32>
    %282 = arith.mulf %277, %281 : vector<8x32xf32>
    %c8_i32_100 = arith.constant 8 : i32
    %283 = arith.muli %c0_i32_92, %c8_i32_100 : i32
    %284 = tpu.assume_multiple %283, 8 : i32
    %285 = arith.index_cast %284 : i32 to index
    %c0_101 = arith.constant 0 : index
    %286 = vector.load %arg12[%285, %c0_101] : memref<64x32xf32, #tpu.memory_space<vmem>>, vector<8x32xf32>
    tpu.vector_store %arg12[%285, %c0_101], %282 {strides = array<i32>} : memref<64x32xf32, #tpu.memory_space<vmem>>, vector<8x32xf32>,
    %c1_i32_102 = arith.constant 1 : i32
    %cst_103 = arith.constant dense<0.000000e+00> : vector<8x128xf32>
    %287 = tpu.matmul %282, %14, %cst_103 {dimension_numbers = #tpu.dot_dimension_numbers<[1], [0], [0], [1], [0, 0, 1, 1], [], []>} : vector<8x32xf32>, vector<32x128xf32>, vector<8x128xf32> -> vector<8x128xf32>
    %288 = arith.addf %258, %287 : vector<8x128xf32>
    %289 = math.tanh %288 : vector<8x128xf32>
    %290 = vector.extract_strided_slice %289 {offsets = [0, 0], sizes = [8, 32], strides = [1, 1]} : vector<8x128xf32> to vector<8x32xf32>
    %cst_104 = arith.constant 5.000000e-01 : f32
    %291 = vector.broadcast %cst_104 : f32 to vector<8x32xf32>
    %292 = arith.mulf %291, %290 : vector<8x32xf32>
    %cst_105 = arith.constant 5.000000e-01 : f32
    %293 = vector.broadcast %cst_105 : f32 to vector<8x32xf32>
    %294 = arith.addf %292, %293 : vector<8x32xf32>
    %295 = vector.extract_strided_slice %289 {offsets = [0, 32], sizes = [8, 32], strides = [1, 1]} : vector<8x128xf32> to vector<8x32xf32>
    %cst_106 = arith.constant 5.000000e-01 : f32
    %296 = vector.broadcast %cst_106 : f32 to vector<8x32xf32>
    %297 = arith.mulf %296, %295 : vector<8x32xf32>
    %cst_107 = arith.constant 5.000000e-01 : f32
    %298 = vector.broadcast %cst_107 : f32 to vector<8x32xf32>
    %299 = arith.addf %297, %298 : vector<8x32xf32>
    %300 = vector.extract_strided_slice %289 {offsets = [0, 64], sizes = [8, 32], strides = [1, 1]} : vector<8x128xf32> to vector<8x32xf32>
    %301 = vector.extract_strided_slice %289 {offsets = [0, 96], sizes = [8, 32], strides = [1, 1]} : vector<8x128xf32> to vector<8x32xf32>
    %cst_108 = arith.constant 5.000000e-01 : f32
    %302 = vector.broadcast %cst_108 : f32 to vector<8x32xf32>
    %303 = arith.mulf %302, %301 : vector<8x32xf32>
    %cst_109 = arith.constant 5.000000e-01 : f32
    %304 = vector.broadcast %cst_109 : f32 to vector<8x32xf32>
    %305 = arith.addf %303, %304 : vector<8x32xf32>
    %306 = arith.mulf %299, %280 : vector<8x32xf32>
    %307 = arith.mulf %294, %300 : vector<8x32xf32>
    %308 = arith.addf %306, %307 : vector<8x32xf32>
    %309 = math.tanh %308 : vector<8x32xf32>
    %310 = arith.mulf %305, %309 : vector<8x32xf32>
    %c8_i32_110 = arith.constant 8 : i32
    %311 = arith.muli %c1_i32_102, %c8_i32_110 : i32
    %312 = tpu.assume_multiple %311, 8 : i32
    %313 = arith.index_cast %312 : i32 to index
    %c0_111 = arith.constant 0 : index
    %314 = vector.load %arg12[%313, %c0_111] : memref<64x32xf32, #tpu.memory_space<vmem>>, vector<8x32xf32>
    tpu.vector_store %arg12[%313, %c0_111], %310 {strides = array<i32>} : memref<64x32xf32, #tpu.memory_space<vmem>>, vector<8x32xf32>,
    %c2_i32_112 = arith.constant 2 : i32
    %cst_113 = arith.constant dense<0.000000e+00> : vector<8x128xf32>
    %315 = tpu.matmul %310, %14, %cst_113 {dimension_numbers = #tpu.dot_dimension_numbers<[1], [0], [0], [1], [0, 0, 1, 1], [], []>} : vector<8x32xf32>, vector<32x128xf32>, vector<8x128xf32> -> vector<8x128xf32>
    %316 = arith.addf %258, %315 : vector<8x128xf32>
    %317 = math.tanh %316 : vector<8x128xf32>
    %318 = vector.extract_strided_slice %317 {offsets = [0, 0], sizes = [8, 32], strides = [1, 1]} : vector<8x128xf32> to vector<8x32xf32>
    %cst_114 = arith.constant 5.000000e-01 : f32
    %319 = vector.broadcast %cst_114 : f32 to vector<8x32xf32>
    %320 = arith.mulf %319, %318 : vector<8x32xf32>
    %cst_115 = arith.constant 5.000000e-01 : f32
    %321 = vector.broadcast %cst_115 : f32 to vector<8x32xf32>
    %322 = arith.addf %320, %321 : vector<8x32xf32>
    %323 = vector.extract_strided_slice %317 {offsets = [0, 32], sizes = [8, 32], strides = [1, 1]} : vector<8x128xf32> to vector<8x32xf32>
    %cst_116 = arith.constant 5.000000e-01 : f32
    %324 = vector.broadcast %cst_116 : f32 to vector<8x32xf32>
    %325 = arith.mulf %324, %323 : vector<8x32xf32>
    %cst_117 = arith.constant 5.000000e-01 : f32
    %326 = vector.broadcast %cst_117 : f32 to vector<8x32xf32>
    %327 = arith.addf %325, %326 : vector<8x32xf32>
    %328 = vector.extract_strided_slice %317 {offsets = [0, 64], sizes = [8, 32], strides = [1, 1]} : vector<8x128xf32> to vector<8x32xf32>
    %329 = vector.extract_strided_slice %317 {offsets = [0, 96], sizes = [8, 32], strides = [1, 1]} : vector<8x128xf32> to vector<8x32xf32>
    %cst_118 = arith.constant 5.000000e-01 : f32
    %330 = vector.broadcast %cst_118 : f32 to vector<8x32xf32>
    %331 = arith.mulf %330, %329 : vector<8x32xf32>
    %cst_119 = arith.constant 5.000000e-01 : f32
    %332 = vector.broadcast %cst_119 : f32 to vector<8x32xf32>
    %333 = arith.addf %331, %332 : vector<8x32xf32>
    %334 = arith.mulf %327, %308 : vector<8x32xf32>
    %335 = arith.mulf %322, %328 : vector<8x32xf32>
    %336 = arith.addf %334, %335 : vector<8x32xf32>
    %337 = math.tanh %336 : vector<8x32xf32>
    %338 = arith.mulf %333, %337 : vector<8x32xf32>
    %c8_i32_120 = arith.constant 8 : i32
    %339 = arith.muli %c2_i32_112, %c8_i32_120 : i32
    %340 = tpu.assume_multiple %339, 8 : i32
    %341 = arith.index_cast %340 : i32 to index
    %c0_121 = arith.constant 0 : index
    %342 = vector.load %arg12[%341, %c0_121] : memref<64x32xf32, #tpu.memory_space<vmem>>, vector<8x32xf32>
    tpu.vector_store %arg12[%341, %c0_121], %338 {strides = array<i32>} : memref<64x32xf32, #tpu.memory_space<vmem>>, vector<8x32xf32>,
    %c3_i32_122 = arith.constant 3 : i32
    %cst_123 = arith.constant dense<0.000000e+00> : vector<8x128xf32>
    %343 = tpu.matmul %338, %14, %cst_123 {dimension_numbers = #tpu.dot_dimension_numbers<[1], [0], [0], [1], [0, 0, 1, 1], [], []>} : vector<8x32xf32>, vector<32x128xf32>, vector<8x128xf32> -> vector<8x128xf32>
    %344 = arith.addf %258, %343 : vector<8x128xf32>
    %345 = math.tanh %344 : vector<8x128xf32>
    %346 = vector.extract_strided_slice %345 {offsets = [0, 0], sizes = [8, 32], strides = [1, 1]} : vector<8x128xf32> to vector<8x32xf32>
    %cst_124 = arith.constant 5.000000e-01 : f32
    %347 = vector.broadcast %cst_124 : f32 to vector<8x32xf32>
    %348 = arith.mulf %347, %346 : vector<8x32xf32>
    %cst_125 = arith.constant 5.000000e-01 : f32
    %349 = vector.broadcast %cst_125 : f32 to vector<8x32xf32>
    %350 = arith.addf %348, %349 : vector<8x32xf32>
    %351 = vector.extract_strided_slice %345 {offsets = [0, 32], sizes = [8, 32], strides = [1, 1]} : vector<8x128xf32> to vector<8x32xf32>
    %cst_126 = arith.constant 5.000000e-01 : f32
    %352 = vector.broadcast %cst_126 : f32 to vector<8x32xf32>
    %353 = arith.mulf %352, %351 : vector<8x32xf32>
    %cst_127 = arith.constant 5.000000e-01 : f32
    %354 = vector.broadcast %cst_127 : f32 to vector<8x32xf32>
    %355 = arith.addf %353, %354 : vector<8x32xf32>
    %356 = vector.extract_strided_slice %345 {offsets = [0, 64], sizes = [8, 32], strides = [1, 1]} : vector<8x128xf32> to vector<8x32xf32>
    %357 = vector.extract_strided_slice %345 {offsets = [0, 96], sizes = [8, 32], strides = [1, 1]} : vector<8x128xf32> to vector<8x32xf32>
    %cst_128 = arith.constant 5.000000e-01 : f32
    %358 = vector.broadcast %cst_128 : f32 to vector<8x32xf32>
    %359 = arith.mulf %358, %357 : vector<8x32xf32>
    %cst_129 = arith.constant 5.000000e-01 : f32
    %360 = vector.broadcast %cst_129 : f32 to vector<8x32xf32>
    %361 = arith.addf %359, %360 : vector<8x32xf32>
    %362 = arith.mulf %355, %336 : vector<8x32xf32>
    %363 = arith.mulf %350, %356 : vector<8x32xf32>
    %364 = arith.addf %362, %363 : vector<8x32xf32>
    %365 = math.tanh %364 : vector<8x32xf32>
    %366 = arith.mulf %361, %365 : vector<8x32xf32>
    %c8_i32_130 = arith.constant 8 : i32
    %367 = arith.muli %c3_i32_122, %c8_i32_130 : i32
    %368 = tpu.assume_multiple %367, 8 : i32
    %369 = arith.index_cast %368 : i32 to index
    %c0_131 = arith.constant 0 : index
    %370 = vector.load %arg12[%369, %c0_131] : memref<64x32xf32, #tpu.memory_space<vmem>>, vector<8x32xf32>
    tpu.vector_store %arg12[%369, %c0_131], %366 {strides = array<i32>} : memref<64x32xf32, #tpu.memory_space<vmem>>, vector<8x32xf32>,
    %c4_i32_132 = arith.constant 4 : i32
    %cst_133 = arith.constant dense<0.000000e+00> : vector<8x128xf32>
    %371 = tpu.matmul %366, %14, %cst_133 {dimension_numbers = #tpu.dot_dimension_numbers<[1], [0], [0], [1], [0, 0, 1, 1], [], []>} : vector<8x32xf32>, vector<32x128xf32>, vector<8x128xf32> -> vector<8x128xf32>
    %372 = arith.addf %258, %371 : vector<8x128xf32>
    %373 = math.tanh %372 : vector<8x128xf32>
    %374 = vector.extract_strided_slice %373 {offsets = [0, 0], sizes = [8, 32], strides = [1, 1]} : vector<8x128xf32> to vector<8x32xf32>
    %cst_134 = arith.constant 5.000000e-01 : f32
    %375 = vector.broadcast %cst_134 : f32 to vector<8x32xf32>
    %376 = arith.mulf %375, %374 : vector<8x32xf32>
    %cst_135 = arith.constant 5.000000e-01 : f32
    %377 = vector.broadcast %cst_135 : f32 to vector<8x32xf32>
    %378 = arith.addf %376, %377 : vector<8x32xf32>
    %379 = vector.extract_strided_slice %373 {offsets = [0, 32], sizes = [8, 32], strides = [1, 1]} : vector<8x128xf32> to vector<8x32xf32>
    %cst_136 = arith.constant 5.000000e-01 : f32
    %380 = vector.broadcast %cst_136 : f32 to vector<8x32xf32>
    %381 = arith.mulf %380, %379 : vector<8x32xf32>
    %cst_137 = arith.constant 5.000000e-01 : f32
    %382 = vector.broadcast %cst_137 : f32 to vector<8x32xf32>
    %383 = arith.addf %381, %382 : vector<8x32xf32>
    %384 = vector.extract_strided_slice %373 {offsets = [0, 64], sizes = [8, 32], strides = [1, 1]} : vector<8x128xf32> to vector<8x32xf32>
    %385 = vector.extract_strided_slice %373 {offsets = [0, 96], sizes = [8, 32], strides = [1, 1]} : vector<8x128xf32> to vector<8x32xf32>
    %cst_138 = arith.constant 5.000000e-01 : f32
    %386 = vector.broadcast %cst_138 : f32 to vector<8x32xf32>
    %387 = arith.mulf %386, %385 : vector<8x32xf32>
    %cst_139 = arith.constant 5.000000e-01 : f32
    %388 = vector.broadcast %cst_139 : f32 to vector<8x32xf32>
    %389 = arith.addf %387, %388 : vector<8x32xf32>
    %390 = arith.mulf %383, %364 : vector<8x32xf32>
    %391 = arith.mulf %378, %384 : vector<8x32xf32>
    %392 = arith.addf %390, %391 : vector<8x32xf32>
    %393 = math.tanh %392 : vector<8x32xf32>
    %394 = arith.mulf %389, %393 : vector<8x32xf32>
    %c8_i32_140 = arith.constant 8 : i32
    %395 = arith.muli %c4_i32_132, %c8_i32_140 : i32
    %396 = tpu.assume_multiple %395, 8 : i32
    %397 = arith.index_cast %396 : i32 to index
    %c0_141 = arith.constant 0 : index
    %398 = vector.load %arg12[%397, %c0_141] : memref<64x32xf32, #tpu.memory_space<vmem>>, vector<8x32xf32>
    tpu.vector_store %arg12[%397, %c0_141], %394 {strides = array<i32>} : memref<64x32xf32, #tpu.memory_space<vmem>>, vector<8x32xf32>,
    %c5_i32_142 = arith.constant 5 : i32
    %cst_143 = arith.constant dense<0.000000e+00> : vector<8x128xf32>
    %399 = tpu.matmul %394, %14, %cst_143 {dimension_numbers = #tpu.dot_dimension_numbers<[1], [0], [0], [1], [0, 0, 1, 1], [], []>} : vector<8x32xf32>, vector<32x128xf32>, vector<8x128xf32> -> vector<8x128xf32>
    %400 = arith.addf %258, %399 : vector<8x128xf32>
    %401 = math.tanh %400 : vector<8x128xf32>
    %402 = vector.extract_strided_slice %401 {offsets = [0, 0], sizes = [8, 32], strides = [1, 1]} : vector<8x128xf32> to vector<8x32xf32>
    %cst_144 = arith.constant 5.000000e-01 : f32
    %403 = vector.broadcast %cst_144 : f32 to vector<8x32xf32>
    %404 = arith.mulf %403, %402 : vector<8x32xf32>
    %cst_145 = arith.constant 5.000000e-01 : f32
    %405 = vector.broadcast %cst_145 : f32 to vector<8x32xf32>
    %406 = arith.addf %404, %405 : vector<8x32xf32>
    %407 = vector.extract_strided_slice %401 {offsets = [0, 32], sizes = [8, 32], strides = [1, 1]} : vector<8x128xf32> to vector<8x32xf32>
    %cst_146 = arith.constant 5.000000e-01 : f32
    %408 = vector.broadcast %cst_146 : f32 to vector<8x32xf32>
    %409 = arith.mulf %408, %407 : vector<8x32xf32>
    %cst_147 = arith.constant 5.000000e-01 : f32
    %410 = vector.broadcast %cst_147 : f32 to vector<8x32xf32>
    %411 = arith.addf %409, %410 : vector<8x32xf32>
    %412 = vector.extract_strided_slice %401 {offsets = [0, 64], sizes = [8, 32], strides = [1, 1]} : vector<8x128xf32> to vector<8x32xf32>
    %413 = vector.extract_strided_slice %401 {offsets = [0, 96], sizes = [8, 32], strides = [1, 1]} : vector<8x128xf32> to vector<8x32xf32>
    %cst_148 = arith.constant 5.000000e-01 : f32
    %414 = vector.broadcast %cst_148 : f32 to vector<8x32xf32>
    %415 = arith.mulf %414, %413 : vector<8x32xf32>
    %cst_149 = arith.constant 5.000000e-01 : f32
    %416 = vector.broadcast %cst_149 : f32 to vector<8x32xf32>
    %417 = arith.addf %415, %416 : vector<8x32xf32>
    %418 = arith.mulf %411, %392 : vector<8x32xf32>
    %419 = arith.mulf %406, %412 : vector<8x32xf32>
    %420 = arith.addf %418, %419 : vector<8x32xf32>
    %421 = math.tanh %420 : vector<8x32xf32>
    %422 = arith.mulf %417, %421 : vector<8x32xf32>
    %c8_i32_150 = arith.constant 8 : i32
    %423 = arith.muli %c5_i32_142, %c8_i32_150 : i32
    %424 = tpu.assume_multiple %423, 8 : i32
    %425 = arith.index_cast %424 : i32 to index
    %c0_151 = arith.constant 0 : index
    %426 = vector.load %arg12[%425, %c0_151] : memref<64x32xf32, #tpu.memory_space<vmem>>, vector<8x32xf32>
    tpu.vector_store %arg12[%425, %c0_151], %422 {strides = array<i32>} : memref<64x32xf32, #tpu.memory_space<vmem>>, vector<8x32xf32>,
    %c6_i32_152 = arith.constant 6 : i32
    %cst_153 = arith.constant dense<0.000000e+00> : vector<8x128xf32>
    %427 = tpu.matmul %422, %14, %cst_153 {dimension_numbers = #tpu.dot_dimension_numbers<[1], [0], [0], [1], [0, 0, 1, 1], [], []>} : vector<8x32xf32>, vector<32x128xf32>, vector<8x128xf32> -> vector<8x128xf32>
    %428 = arith.addf %258, %427 : vector<8x128xf32>
    %429 = math.tanh %428 : vector<8x128xf32>
    %430 = vector.extract_strided_slice %429 {offsets = [0, 0], sizes = [8, 32], strides = [1, 1]} : vector<8x128xf32> to vector<8x32xf32>
    %cst_154 = arith.constant 5.000000e-01 : f32
    %431 = vector.broadcast %cst_154 : f32 to vector<8x32xf32>
    %432 = arith.mulf %431, %430 : vector<8x32xf32>
    %cst_155 = arith.constant 5.000000e-01 : f32
    %433 = vector.broadcast %cst_155 : f32 to vector<8x32xf32>
    %434 = arith.addf %432, %433 : vector<8x32xf32>
    %435 = vector.extract_strided_slice %429 {offsets = [0, 32], sizes = [8, 32], strides = [1, 1]} : vector<8x128xf32> to vector<8x32xf32>
    %cst_156 = arith.constant 5.000000e-01 : f32
    %436 = vector.broadcast %cst_156 : f32 to vector<8x32xf32>
    %437 = arith.mulf %436, %435 : vector<8x32xf32>
    %cst_157 = arith.constant 5.000000e-01 : f32
    %438 = vector.broadcast %cst_157 : f32 to vector<8x32xf32>
    %439 = arith.addf %437, %438 : vector<8x32xf32>
    %440 = vector.extract_strided_slice %429 {offsets = [0, 64], sizes = [8, 32], strides = [1, 1]} : vector<8x128xf32> to vector<8x32xf32>
    %441 = vector.extract_strided_slice %429 {offsets = [0, 96], sizes = [8, 32], strides = [1, 1]} : vector<8x128xf32> to vector<8x32xf32>
    %cst_158 = arith.constant 5.000000e-01 : f32
    %442 = vector.broadcast %cst_158 : f32 to vector<8x32xf32>
    %443 = arith.mulf %442, %441 : vector<8x32xf32>
    %cst_159 = arith.constant 5.000000e-01 : f32
    %444 = vector.broadcast %cst_159 : f32 to vector<8x32xf32>
    %445 = arith.addf %443, %444 : vector<8x32xf32>
    %446 = arith.mulf %439, %420 : vector<8x32xf32>
    %447 = arith.mulf %434, %440 : vector<8x32xf32>
    %448 = arith.addf %446, %447 : vector<8x32xf32>
    %449 = math.tanh %448 : vector<8x32xf32>
    %450 = arith.mulf %445, %449 : vector<8x32xf32>
    %c8_i32_160 = arith.constant 8 : i32
    %451 = arith.muli %c6_i32_152, %c8_i32_160 : i32
    %452 = tpu.assume_multiple %451, 8 : i32
    %453 = arith.index_cast %452 : i32 to index
    %c0_161 = arith.constant 0 : index
    %454 = vector.load %arg12[%453, %c0_161] : memref<64x32xf32, #tpu.memory_space<vmem>>, vector<8x32xf32>
    tpu.vector_store %arg12[%453, %c0_161], %450 {strides = array<i32>} : memref<64x32xf32, #tpu.memory_space<vmem>>, vector<8x32xf32>,
    %c7_i32_162 = arith.constant 7 : i32
    %cst_163 = arith.constant dense<0.000000e+00> : vector<8x128xf32>
    %455 = tpu.matmul %450, %14, %cst_163 {dimension_numbers = #tpu.dot_dimension_numbers<[1], [0], [0], [1], [0, 0, 1, 1], [], []>} : vector<8x32xf32>, vector<32x128xf32>, vector<8x128xf32> -> vector<8x128xf32>
    %456 = arith.addf %258, %455 : vector<8x128xf32>
    %457 = math.tanh %456 : vector<8x128xf32>
    %458 = vector.extract_strided_slice %457 {offsets = [0, 0], sizes = [8, 32], strides = [1, 1]} : vector<8x128xf32> to vector<8x32xf32>
    %cst_164 = arith.constant 5.000000e-01 : f32
    %459 = vector.broadcast %cst_164 : f32 to vector<8x32xf32>
    %460 = arith.mulf %459, %458 : vector<8x32xf32>
    %cst_165 = arith.constant 5.000000e-01 : f32
    %461 = vector.broadcast %cst_165 : f32 to vector<8x32xf32>
    %462 = arith.addf %460, %461 : vector<8x32xf32>
    %463 = vector.extract_strided_slice %457 {offsets = [0, 32], sizes = [8, 32], strides = [1, 1]} : vector<8x128xf32> to vector<8x32xf32>
    %cst_166 = arith.constant 5.000000e-01 : f32
    %464 = vector.broadcast %cst_166 : f32 to vector<8x32xf32>
    %465 = arith.mulf %464, %463 : vector<8x32xf32>
    %cst_167 = arith.constant 5.000000e-01 : f32
    %466 = vector.broadcast %cst_167 : f32 to vector<8x32xf32>
    %467 = arith.addf %465, %466 : vector<8x32xf32>
    %468 = vector.extract_strided_slice %457 {offsets = [0, 64], sizes = [8, 32], strides = [1, 1]} : vector<8x128xf32> to vector<8x32xf32>
    %469 = vector.extract_strided_slice %457 {offsets = [0, 96], sizes = [8, 32], strides = [1, 1]} : vector<8x128xf32> to vector<8x32xf32>
    %cst_168 = arith.constant 5.000000e-01 : f32
    %470 = vector.broadcast %cst_168 : f32 to vector<8x32xf32>
    %471 = arith.mulf %470, %469 : vector<8x32xf32>
    %cst_169 = arith.constant 5.000000e-01 : f32
    %472 = vector.broadcast %cst_169 : f32 to vector<8x32xf32>
    %473 = arith.addf %471, %472 : vector<8x32xf32>
    %474 = arith.mulf %467, %448 : vector<8x32xf32>
    %475 = arith.mulf %462, %468 : vector<8x32xf32>
    %476 = arith.addf %474, %475 : vector<8x32xf32>
    %477 = math.tanh %476 : vector<8x32xf32>
    %478 = arith.mulf %473, %477 : vector<8x32xf32>
    %c8_i32_170 = arith.constant 8 : i32
    %479 = arith.muli %c7_i32_162, %c8_i32_170 : i32
    %480 = tpu.assume_multiple %479, 8 : i32
    %481 = arith.index_cast %480 : i32 to index
    %c0_171 = arith.constant 0 : index
    %482 = vector.load %arg12[%481, %c0_171] : memref<64x32xf32, #tpu.memory_space<vmem>>, vector<8x32xf32>
    tpu.vector_store %arg12[%481, %c0_171], %478 {strides = array<i32>} : memref<64x32xf32, #tpu.memory_space<vmem>>, vector<8x32xf32>,
    %c8_i32_172 = arith.constant 8 : i32
    %c0_173 = arith.constant 0 : index
    %c0_174 = arith.constant 0 : index
    %483 = vector.load %arg12[%c0_173, %c0_174] : memref<64x32xf32, #tpu.memory_space<vmem>>, vector<64x32xf32>
    %c0_175 = arith.constant 0 : index
    %c0_176 = arith.constant 0 : index
    %484 = vector.load %arg8[%c0_175, %c0_176] : memref<32x8xf32, #tpu.memory_space<vmem>>, vector<32x8xf32>
    %cst_177 = arith.constant dense<0.000000e+00> : vector<64x8xf32>
    %485 = tpu.matmul %483, %484, %cst_177 {dimension_numbers = #tpu.dot_dimension_numbers<[1], [0], [0], [1], [0, 0, 1, 1], [], []>} : vector<64x32xf32>, vector<32x8xf32>, vector<64x8xf32> -> vector<64x8xf32>
    %c0_178 = arith.constant 0 : index
    %c0_179 = arith.constant 0 : index
    %486 = vector.load %arg9[%c0_178, %c0_179] : memref<1x8xf32, #tpu.memory_space<vmem>>, vector<1x8xf32>
    %487 = vector.broadcast %486 : vector<1x8xf32> to vector<64x8xf32>
    %488 = arith.addf %485, %487 : vector<64x8xf32>
    %c0_180 = arith.constant 0 : index
    %c0_181 = arith.constant 0 : index
    %489 = vector.load %arg10[%c0_180, %c0_181] : memref<64x8xf32, #tpu.memory_space<vmem>>, vector<64x8xf32>
    tpu.vector_store %arg10[%c0_180, %c0_181], %488 {strides = array<i32>} : memref<64x8xf32, #tpu.memory_space<vmem>>, vector<64x8xf32>,
    return
  }
  func.func @transform_0(%arg0: i32) -> (i32, i32) {
    %c0_i32 = arith.constant 0 : i32
    %c0_i32_0 = arith.constant 0 : i32
    return %arg0, %c0_i32 : i32, i32
  }
  func.func @transform_1(%arg0: i32) -> (i32, i32) {
    %c0_i32 = arith.constant 0 : i32
    %c0_i32_0 = arith.constant 0 : i32
    %c0_i32_1 = arith.constant 0 : i32
    return %c0_i32, %c0_i32_0 : i32, i32
  }
  func.func @transform_2(%arg0: i32) -> (i32, i32) {
    %c0_i32 = arith.constant 0 : i32
    %c0_i32_0 = arith.constant 0 : i32
    %c0_i32_1 = arith.constant 0 : i32
    return %c0_i32, %c0_i32_0 : i32, i32
  }
  func.func @transform_3(%arg0: i32) -> (i32, i32) {
    %c0_i32 = arith.constant 0 : i32
    %c0_i32_0 = arith.constant 0 : i32
    %c0_i32_1 = arith.constant 0 : i32
    return %c0_i32, %c0_i32_0 : i32, i32
  }
  func.func @transform_4(%arg0: i32) -> (i32, i32) {
    %c0_i32 = arith.constant 0 : i32
    %c0_i32_0 = arith.constant 0 : i32
    %c0_i32_1 = arith.constant 0 : i32
    return %c0_i32, %c0_i32_0 : i32, i32
  }
  func.func @transform_5(%arg0: i32) -> (i32, i32) {
    %c0_i32 = arith.constant 0 : i32
    %c0_i32_0 = arith.constant 0 : i32
    %c0_i32_1 = arith.constant 0 : i32
    return %c0_i32, %c0_i32_0 : i32, i32
  }
  func.func @transform_6(%arg0: i32) -> (i32, i32) {
    %c0_i32 = arith.constant 0 : i32
    %c0_i32_0 = arith.constant 0 : i32
    %c0_i32_1 = arith.constant 0 : i32
    return %c0_i32, %c0_i32_0 : i32, i32
  }
  func.func @transform_7(%arg0: i32) -> (i32, i32) {
    %c0_i32 = arith.constant 0 : i32
    %c0_i32_0 = arith.constant 0 : i32
    %c0_i32_1 = arith.constant 0 : i32
    return %c0_i32, %c0_i32_0 : i32, i32
  }
  func.func @transform_8(%arg0: i32) -> (i32, i32) {
    %c0_i32 = arith.constant 0 : i32
    %c0_i32_0 = arith.constant 0 : i32
    %c0_i32_1 = arith.constant 0 : i32
    return %c0_i32, %c0_i32_0 : i32, i32
  }
  func.func @transform_9(%arg0: i32) -> (i32, i32) {
    %c0_i32 = arith.constant 0 : i32
    %c0_i32_0 = arith.constant 0 : i32
    return %arg0, %c0_i32 : i32, i32
  }
}

</mosaic_0001>

<bundles_post_ra>
// kernel: lstm_autoencoder.1
= control target key start
LH: loop header
LB: loop body
LE: loop exit
PB: predicated region body
PF: predicated region fallthrough
CT: control target
= control target key end

     0   :  { %v32_v0 = vlaneseq  ;;  %vm72_vm0 = vcmask 64512   ;;  %v2571_v2 = vmov 0.0|0.0   ;;  %vm2572_vm1 = vmmov 0   ;;  %s2576_s13 = smov 32   ;;  %s3022_s0 = inlined_call_operand.vmem [shape: f32[64,8], index: 0, kind: input, shape index: {}]   ;;  %s3023_s1 = inlined_call_operand.vmem [shape: f32[8,128], index: 1, kind: input, shape index: {}]   ;;  %s3024_s2 = inlined_call_operand.vmem [shape: f32[32,128], index: 2, kind: input, shape index: {}]   ;;  %s3025_s3 = inlined_call_operand.vmem [shape: f32[1,128], index: 3, kind: input, shape index: {}]   ;;  %s3026_s4 = inlined_call_operand.vmem [shape: f32[32,128], index: 4, kind: input, shape index: {}]   ;;  %s3027_s5 = inlined_call_operand.vmem [shape: f32[32,128], index: 5, kind: input, shape index: {}]   ;;  %s3028_s6 = inlined_call_operand.vmem [shape: f32[1,128], index: 6, kind: input, shape index: {}]   ;;  %s3029_s7 = inlined_call_operand.vmem [shape: f32[32,8], index: 7, kind: input, shape index: {}]   ;;  %s3030_s8 = inlined_call_operand.vmem [shape: f32[1,8], index: 8, kind: input, shape index: {}]   ;;  %s3031_s9 = inlined_call_operand.vmem [shape: f32[64,8], index: 9, kind: output, shape index: {}]  }
   0x1   :  { %v58_v1 = vld [vmem:[%s3022_s0] sm:$0xff]  ;;  %2397 = vmatprep.subr.bf16.mxu1 %v2571_v2  ;;  %v2573_v4 = vmov 0.0   ;;  %v39_v7 = vld [vmem:[%s3024_s2 + $0x8] sm:$0xff]  ;;  %v40_v8 = vld [vmem:[%s3024_s2 + $0x10] sm:$0xff]  ;;  %v2574_v10 = vmov 0.5   ;;  %vm211_vm5 = vcmask 261120  }
   0x2   :  { %v33_v3 = vand.u32 127, %v32_v0  ;;  %2172 = vmatprep.mubr.msk.f32.mxu0 %vm72_vm0, %v58_v1  ;;  %2203 = vmatprep.mubr.msk.f32.mxu1 %vm2572_vm1, %v2573_v4  ;;  %v54_v5 = vld [vmem:[%s3023_s1] sm:$0xff]  ;;  %v41_v9 = vld [vmem:[%s3024_s2 + $0x18] sm:$0xff]  ;;  %v59_v15 = vld [vmem:[%s3022_s0 + $0x8] sm:$0xff]  ;;  %v2706_v26 = vshrl.u32 %v32_v0, 7 }
   0x3   :  { %v38_v6 = vld [vmem:[%s3024_s2] sm:$0xff]  ;;  %v60_v19 = vld [vmem:[%s3022_s0 + $0x10] sm:$0xff]  ;;  %v61_v20 = vld [vmem:[%s3022_s0 + $0x18] sm:$0xff] }
   0x4   :  { %vm34_vm2 = vcmp.ge.s32.totalorder %v33_v3, 64  ;;  %vm35_vm3 = vcmp.lt.s32.totalorder %v33_v3, 96  ;;  %v62_v22 = vld [vmem:[%s3022_s0 + $0x20] sm:$0xff]  ;;  %v63_v23 = vld [vmem:[%s3022_s0 + $0x28] sm:$0xff]  ;;  %v64_v24 = vld [vmem:[%s3022_s0 + $0x30] sm:$0xff]  ;;  %v69_v29 = vsub.s32 0, %v2706_v26 }
   0x5   :  { %vm36_vm4 = vmand %vm34_vm2, %vm35_vm3  ;;  %v65_v25 = vld [vmem:[%s3022_s0 + $0x38] sm:$0xff]  ;;  %v56_v27 = vld [vmem:[%s3025_s3] sm:$0x1]  ;;  %s2575_s3 = smov 64  }
   0x6   :  { %v2649_v11 = vsel %vm36_vm4, 1.0, %v2574_v10 }
   0x7   :  { %v55_v12 = vmul.f32 %v54_v5, %v2649_v11  ;;  %v42_v13 = vmul.f32 %v38_v6, %v2649_v11  ;;  %v43_v14 = vmul.f32 %v39_v7, %v2649_v11  ;;  %v44_v16 = vmul.f32 %v40_v8, %v2649_v11 }
   0x8   :  { %v45_v17 = vmul.f32 %v41_v9, %v2649_v11  ;;  %v57_v28 = vmul.f32 %v56_v27, %v2649_v11 }
   0x9   :  { %2170 = vmatprep.subr.mxu0 %v55_v12  ;;  %v2659_v18 = vpack.c.bf16 %v43_v14, %v42_v13 }
   0xa   :  { %2171 = vmatpush3.msra.mxu0 %v55_v12  ;;  %v2671_v21 = vpack.c.bf16 %v45_v17, %v44_v16  ;;  %v70_v30 = vrot.slane %v57_v28, %v69_v29 }
   0xb   :  { %2173 = vmatmul.mubr.msk.f32.vlgmr.msra.gmra.mrb[0].mxu0 %vm72_vm0, %v59_v15  ;;  %2391 = vmatprep.subr.bf16.mxu0 %v2571_v2 }
   0xc   :  { %2393 = vmatpush3.bf16.msra.mxu0 %v2659_v18  ;;  %2175 = vmatprep.mubr.msk.f32.mxu0 %vm72_vm0, %v60_v19 }
   0xd   :  { %2394 = vmatprep.subr.bf16.mxu0 %v2571_v2  ;;  %2399 = vmatpush3.bf16.msra.mxu1 %v2659_v18 }
   0xe   :  { %2400 = vmatprep.subr.bf16.mxu1 %v2571_v2 }
   0xf   :  { %2176 = vmatmul.mubr.msk.f32.gmra.mrb[2].mxu0 %vm72_vm0, %v61_v20 }
  0x10   :  { %2178 = vmatprep.mubr.msk.f32.mxu0 %vm72_vm0, %v62_v22  ;;  %2396 = vmatpush3.bf16.msra.mxu0 %v2671_v21 }
  0x11   :  { %2402 = vmatpush3.bf16.msra.mxu1 %v2671_v21  ;;  %2403 = vmatprep.subr.bf16.mxu0 %v2571_v2 }
  0x12   :  { %2409 = vmatprep.subr.bf16.mxu1 %v2571_v2 }
  0x13   :  { %2179 = vmatmul.mubr.msk.f32.gmra.mrb[4].mxu0 %vm72_vm0, %v63_v23 }
  0x14   :  { %2181 = vmatprep.mubr.msk.f32.mxu0 %vm72_vm0, %v64_v24 }
  0x17   :  { %2182 = vmatmul.mubr.msk.f32.gmra.mrb[6].mxu0 %vm72_vm0, %v65_v25 }
  0x18   :  { %2192 = vmatprep.mubr.msk.f32.mxu0 %vm2572_vm1, %v2573_v4 }
  0x1b   :  { %2193 = vmatmul.mubr.f32.vlgmr.msra.gmra.mrb[8].mxu0 %v2573_v4 }
  0x1c   :  { %2405 = vmatpush3.bf16.msra.mxu0 %v2659_v18  ;;  %2214 = vmatprep.mubr.msk.f32.mxu0 %vm2572_vm1, %v2573_v4 }
  0x1d   :  { %2406 = vmatprep.subr.bf16.mxu0 %v2571_v2 }
  0x20   :  { %2408 = vmatpush3.bf16.msra.mxu0 %v2671_v21 }
  0x21   :  { %2415 = vmatprep.subr.bf16.mxu0 %v2571_v2 }
  0xde   :  { %v2174_v31 = vpop.f32.mrb[0].mxu0 }
  0xdf   :  { %v169_v32 = vadd.f32 %v2174_v31, %v70_v30  ;;  %v163_v33 = vpop.f32.mrb[1].mxu0 }
  0xe0   :  { %v164_v46 = vadd.f32 %v163_v33, %v70_v30 }
  0xe2   :  { %v2177_v34 = vpop.f32.mrb[2].mxu0 }
  0xe3   :  { %v2715_v35 = vadd.f32 %v2177_v34, %v70_v30  ;;  %v173_v36 = vpop.f32.mrb[3].mxu0 }
  0xe4   :  { %v2717_v37 = vadd.f32 %v173_v36, %v70_v30 }
  0xe6   :  { %v2180_v38 = vpop.f32.mrb[4].mxu0 }
  0xe7   :  { %v2719_v39 = vadd.f32 %v2180_v38, %v70_v30  ;;  %v183_v40 = vpop.f32.mrb[5].mxu0 }
  0xe8   :  { %v2721_v41 = vadd.f32 %v183_v40, %v70_v30 }
  0xea   :  { %v2183_v42 = vpop.f32.mrb[6].mxu0 }
  0xeb   :  { %v2723_v43 = vadd.f32 %v2183_v42, %v70_v30  ;;  %v193_v44 = vpop.f32.mrb[7].mxu0 }
  0xec   :  { %v2725_v45 = vadd.f32 %v193_v44, %v70_v30 }
  0xee   :  { %v281_v47 = vpop.f32.mrb[8].mxu0 }
  0xef   :  { %v285_v48 = vadd.f32 %v281_v47, %v164_v46  ;;  %v2194_v49 = vpop.f32.mrb[9].mxu0 }
  0xf1   :  { %2507 = vtanh.f32 %v285_v48 }
  0xfb   :  { %v2508_v50 = vpop.eup %2507 }
  0xfc   :  { %291 = vrot.lane.b32.xlu0 %v2508_v50, %s2575_s3  ;;  %v287_v51 = vmul.f32 0.5, %v2508_v50 }
  0xfe   :  { %v288_v52 = vadd.f32 0.5, %v287_v51 }
 0x100   :  { %v289_v55 = vmul.f32 0.0, %v288_v52 }
 0x16e   :  { %v292_v53 = vpop.permute.xlu0 %291 }
 0x16f   :  { %v294_v54 = vmul.f32 %v292_v53, %v288_v52 }
 0x171   :  { %296 = vrot.lane.b32.xlu0 %v294_v54, %s2576_s13 }
 0x1e3   :  { %v297_v56 = vpop.permute.xlu0 %296 }
 0x1e4   :  { %v299_v57 = vadd.f32 %v297_v56, %v289_v55 }
 0x1e6   :  { %2509 = vtanh.f32 %v299_v57 }
 0x1f0   :  { %v2510_v58 = vpop.eup %2509 }
 0x1f1   :  { %302 = vrot.lane.b32.xlu1 %v2510_v58, %s2575_s3 }
 0x263   :  { %v303_v59 = vpop.permute.xlu1 %302 }
 0x264   :  { %v305_v60 = vmul.f32 %v303_v59, %v288_v52 }
 0x266   :  { %309 = vrot.lane.b32.xlu1 %v305_v60, %s2576_s13 }
 0x2d8   :  { %v310_v61 = vpop.permute.xlu1 %309 }
 0x2d9   :  { %2204 = vmatmul.mubr.msk.f32.vlgmr.msra.gmra.mrb[0].mxu1 %vm211_vm5, %v310_v61 }
 0x2da   :  { %2411 = vmatpush3.bf16.msra.mxu1 %v2659_v18  ;;  %2225 = vmatprep.mubr.msk.f32.mxu1 %vm2572_vm1, %v2573_v4 }
 0x2db   :  { %2412 = vmatprep.subr.bf16.mxu1 %v2571_v2 }
 0x2de   :  { %2414 = vmatpush3.bf16.msra.mxu1 %v2671_v21 }
 0x2df   :  { %2421 = vmatprep.subr.bf16.mxu1 %v2571_v2 }
 0x3ac   :  { %v379_v62 = vpop.f32.mrb[0].mxu1 }
 0x3ad   :  { %v383_v63 = vadd.f32 %v379_v62, %v169_v32  ;;  %v2205_v0 = vpop.f32.mrb[1].mxu1 }
 0x3af   :  { %2511 = vtanh.f32 %v383_v63 }
 0x3b9   :  { %v2512_v1 = vpop.eup %2511 }
 0x3ba   :  { %389 = vrot.lane.b32.xlu0 %v2512_v1, %s2575_s3  ;;  %v385_v3 = vmul.f32 0.5, %v2512_v1 }
 0x3bc   :  { %v386_v5 = vadd.f32 0.5, %v385_v3 }
 0x3be   :  { %v387_v8 = vmul.f32 %v386_v5, %v299_v57 }
 0x42c   :  { %v390_v6 = vpop.permute.xlu0 %389 }
 0x42d   :  { %v392_v7 = vmul.f32 %v390_v6, %v386_v5 }
 0x42f   :  { %394 = vrot.lane.b32.xlu1 %v392_v7, %s2576_s13 }
 0x4a1   :  { %v395_v9 = vpop.permute.xlu1 %394 }
 0x4a2   :  { %v397_v10 = vadd.f32 %v395_v9, %v387_v8 }
 0x4a4   :  { %2513 = vtanh.f32 %v397_v10 }
 0x4ae   :  { %v2514_v12 = vpop.eup %2513 }
 0x4af   :  { %400 = vrot.lane.b32.xlu0 %v2514_v12, %s2575_s3 }
 0x521   :  { %v401_v13 = vpop.permute.xlu0 %400 }
 0x522   :  { %v403_v14 = vmul.f32 %v401_v13, %v386_v5 }
 0x524   :  { %407 = vrot.lane.b32.xlu1 %v403_v14, %s2576_s13 }
 0x596   :  { %v408_v15 = vpop.permute.xlu1 %407 }
 0x597   :  { %2215 = vmatmul.mubr.msk.f32.vlgmr.msra.gmra.mrb[10].mxu0 %vm211_vm5, %v408_v15 }
 0x598   :  { %2417 = vmatpush3.bf16.msra.mxu0 %v2659_v18  ;;  %2236 = vmatprep.mubr.msk.f32.mxu0 %vm2572_vm1, %v2573_v4 }
 0x599   :  { %2418 = vmatprep.subr.bf16.mxu0 %v2571_v2 }
 0x59c   :  { %2420 = vmatpush3.bf16.msra.mxu0 %v2671_v21 }
 0x59d   :  { %2427 = vmatprep.subr.bf16.mxu0 %v2571_v2 }
 0x66a   :  { %v477_v16 = vpop.f32.mrb[10].mxu0 }
 0x66b   :  { %v481_v17 = vadd.f32 %v477_v16, %v2717_v37  ;;  %v2216_v19 = vpop.f32.mrb[11].mxu0 }
 0x66d   :  { %2515 = vtanh.f32 %v481_v17 }
 0x677   :  { %v2516_v20 = vpop.eup %2515 }
 0x678   :  { %487 = vrot.lane.b32.xlu0 %v2516_v20, %s2575_s3  ;;  %v483_v22 = vmul.f32 0.5, %v2516_v20 }
 0x67a   :  { %v484_v23 = vadd.f32 0.5, %v483_v22 }
 0x67c   :  { %v485_v27 = vmul.f32 %v484_v23, %v397_v10 }
 0x6ea   :  { %v488_v24 = vpop.permute.xlu0 %487 }
 0x6eb   :  { %v490_v25 = vmul.f32 %v488_v24, %v484_v23 }
 0x6ed   :  { %492 = vrot.lane.b32.xlu1 %v490_v25, %s2576_s13 }
 0x75f   :  { %v493_v28 = vpop.permute.xlu1 %492 }
 0x760   :  { %v495_v30 = vadd.f32 %v493_v28, %v485_v27 }
 0x762   :  { %2517 = vtanh.f32 %v495_v30 }
 0x76c   :  { %v2518_v31 = vpop.eup %2517 }
 0x76d   :  { %498 = vrot.lane.b32.xlu0 %v2518_v31, %s2575_s3 }
 0x7df   :  { %v499_v32 = vpop.permute.xlu0 %498 }
 0x7e0   :  { %v501_v33 = vmul.f32 %v499_v32, %v484_v23 }
 0x7e2   :  { %505 = vrot.lane.b32.xlu1 %v501_v33, %s2576_s13 }
 0x854   :  { %v506_v34 = vpop.permute.xlu1 %505 }
 0x855   :  { %2226 = vmatmul.mubr.msk.f32.vlgmr.msra.gmra.mrb[2].mxu1 %vm211_vm5, %v506_v34 }
 0x856   :  { %2423 = vmatpush3.bf16.msra.mxu1 %v2659_v18  ;;  %2247 = vmatprep.mubr.msk.f32.mxu1 %vm2572_vm1, %v2573_v4 }
 0x857   :  { %2424 = vmatprep.subr.bf16.mxu1 %v2571_v2 }
 0x85a   :  { %2426 = vmatpush3.bf16.msra.mxu1 %v2671_v21 }
 0x85b   :  { %2433 = vmatprep.subr.bf16.mxu1 %v2571_v2 }
 0x928   :  { %v575_v36 = vpop.f32.mrb[2].mxu1 }
 0x929   :  { %v579_v37 = vadd.f32 %v575_v36, %v2715_v35  ;;  %v2227_v38 = vpop.f32.mrb[3].mxu1 }
 0x92b   :  { %2519 = vtanh.f32 %v579_v37 }
 0x935   :  { %v2520_v40 = vpop.eup %2519 }
 0x936   :  { %585 = vrot.lane.b32.xlu0 %v2520_v40, %s2575_s3  ;;  %v581_v42 = vmul.f32 0.5, %v2520_v40 }
 0x938   :  { %v582_v44 = vadd.f32 0.5, %v581_v42 }
 0x93a   :  { %v583_v48 = vmul.f32 %v582_v44, %v495_v30 }
 0x9a8   :  { %v586_v46 = vpop.permute.xlu0 %585 }
 0x9a9   :  { %v588_v47 = vmul.f32 %v586_v46, %v582_v44 }
 0x9ab   :  { %590 = vrot.lane.b32.xlu1 %v588_v47, %s2576_s13 }
 0xa1d   :  { %v591_v49 = vpop.permute.xlu1 %590 }
 0xa1e   :  { %v593_v50 = vadd.f32 %v591_v49, %v583_v48 }
 0xa20   :  { %2521 = vtanh.f32 %v593_v50 }
 0xa2a   :  { %v2522_v51 = vpop.eup %2521 }
 0xa2b   :  { %596 = vrot.lane.b32.xlu0 %v2522_v51, %s2575_s3 }
 0xa9d   :  { %v597_v52 = vpop.permute.xlu0 %596 }
 0xa9e   :  { %v599_v35 = vmul.f32 %v597_v52, %v582_v44 }
 0xaa0   :  { %603 = vrot.lane.b32.xlu1 %v599_v35, %s2576_s13  ;;  %v992_v35 = vld [vmem:[%s3026_s4] sm:$0xff] }
 0xb12   :  { %v604_v53 = vpop.permute.xlu1 %603 }
 0xb13   :  { %2237 = vmatmul.mubr.msk.f32.vlgmr.msra.gmra.mrb[12].mxu0 %vm211_vm5, %v604_v53  ;;  %v46_v53 = vld [vmem:[%s3027_s5] sm:$0xff] }
 0xb14   :  { %2429 = vmatpush3.bf16.msra.mxu0 %v2659_v18  ;;  %2258 = vmatprep.mubr.msk.f32.mxu0 %vm2572_vm1, %v2573_v4 }
 0xb15   :  { %2430 = vmatprep.subr.bf16.mxu0 %v2571_v2 }
 0xb18   :  { %2432 = vmatpush3.bf16.msra.mxu0 %v2671_v21 }
 0xb19   :  { %2439 = vmatprep.subr.bf16.mxu0 %v2571_v2 }
 0xbe6   :  { %v673_v54 = vpop.f32.mrb[12].mxu0 }
 0xbe7   :  { %v677_v55 = vadd.f32 %v673_v54, %v2721_v41  ;;  %v2238_v56 = vpop.f32.mrb[13].mxu0  ;;  %v996_v54 = vmul.f32 %v992_v35, %v2649_v11 }
 0xbe8   :  { %v47_v56 = vld [vmem:[%s3027_s5 + $0x8] sm:$0xff] }
 0xbe9   :  { %2523 = vtanh.f32 %v677_v55 }
 0xbf3   :  { %v2524_v57 = vpop.eup %2523 }
 0xbf4   :  { %683 = vrot.lane.b32.xlu0 %v2524_v57, %s2575_s3  ;;  %v679_v58 = vmul.f32 0.5, %v2524_v57  ;;  %v50_v57 = vmul.f32 %v46_v53, %v2649_v11 }
 0xbf6   :  { %v680_v59 = vadd.f32 0.5, %v679_v58  ;;  %v994_v58 = vld [vmem:[%s3026_s4 + $0x10] sm:$0xff] }
 0xbf8   :  { %v681_v62 = vmul.f32 %v680_v59, %v593_v50 }
 0xc66   :  { %v684_v60 = vpop.permute.xlu0 %683 }
 0xc67   :  { %v686_v61 = vmul.f32 %v684_v60, %v680_v59  ;;  %v51_v60 = vmul.f32 %v47_v56, %v2649_v11 }
 0xc69   :  { %688 = vrot.lane.b32.xlu1 %v686_v61, %s2576_s13  ;;  %v998_v61 = vmul.f32 %v994_v58, %v2649_v11 }
 0xcdb   :  { %v689_v63 = vpop.permute.xlu1 %688 }
 0xcdc   :  { %v691_v0 = vadd.f32 %v689_v63, %v681_v62  ;;  %v48_v63 = vld [vmem:[%s3027_s5 + $0x10] sm:$0xff] }
 0xcde   :  { %2525 = vtanh.f32 %v691_v0 }
 0xce8   :  { %v2526_v1 = vpop.eup %2525 }
 0xce9   :  { %694 = vrot.lane.b32.xlu0 %v2526_v1, %s2575_s3 }
 0xd5b   :  { %v695_v3 = vpop.permute.xlu0 %694 }
 0xd5c   :  { %v697_v41 = vmul.f32 %v695_v3, %v680_v59  ;;  %v995_v59 = vld [vmem:[%s3026_s4 + $0x18] sm:$0xff]  ;;  %v52_v3 = vmul.f32 %v48_v63, %v2649_v11 }
 0xd5d   :  { %v999_v62 = vmul.f32 %v995_v59, %v2649_v11 }
 0xd5e   :  { %701 = vrot.lane.b32.xlu1 %v697_v41, %s2576_s13 }
 0xdd0   :  { %v702_v5 = vpop.permute.xlu1 %701 }
 0xdd1   :  { %2248 = vmatmul.mubr.msk.f32.vlgmr.msra.gmra.mrb[4].mxu1 %vm211_vm5, %v702_v5  ;;  %v2836_v5 = vpack.c.bf16 %v51_v60, %v50_v57 }
 0xdd2   :  { %2435 = vmatpush3.bf16.msra.mxu1 %v2659_v18  ;;  %2269 = vmatprep.mubr.msk.f32.mxu1 %vm2572_vm1, %v2573_v4 }
 0xdd3   :  { %2436 = vmatprep.subr.bf16.mxu1 %v2571_v2 }
 0xdd6   :  { %2438 = vmatpush3.bf16.msra.mxu1 %v2671_v21 }
 0xdd7   :  { %2445 = vmatprep.subr.bf16.mxu1 %v2571_v2 }
 0xea4   :  { %v771_v6 = vpop.f32.mrb[4].mxu1 }
 0xea5   :  { %v775_v7 = vadd.f32 %v771_v6, %v2719_v39  ;;  %v2249_v8 = vpop.f32.mrb[5].mxu1  ;;  %v2443_v6 = vpack.c.bf16 %v999_v62, %v998_v61 }
 0xea7   :  { %2527 = vtanh.f32 %v775_v7 }
 0xeb1   :  { %v2528_v9 = vpop.eup %2527 }
 0xeb2   :  { %781 = vrot.lane.b32.xlu0 %v2528_v9, %s2575_s3  ;;  %v777_v10 = vmul.f32 0.5, %v2528_v9 }
 0xeb4   :  { %v778_v12 = vadd.f32 0.5, %v777_v10 }
 0xeb6   :  { %v779_v14 = vmul.f32 %v778_v12, %v691_v0  ;;  %v49_v0 = vld [vmem:[%s3027_s5 + $0x18] sm:$0xff] }
 0xeb7   :  { %v53_v41 = vmul.f32 %v49_v0, %v2649_v11 }
 0xeb9   :  { %v2840_v7 = vpack.c.bf16 %v53_v41, %v52_v3 }
 0xf24   :  { %v782_v18 = vpop.permute.xlu0 %781 }
 0xf25   :  { %v784_v13 = vmul.f32 %v782_v18, %v778_v12 }
 0xf27   :  { %786 = vrot.lane.b32.xlu1 %v784_v13, %s2576_s13 }
 0xf99   :  { %v787_v15 = vpop.permute.xlu1 %786 }
 0xf9a   :  { %v789_v16 = vadd.f32 %v787_v15, %v779_v14  ;;  %v1000_v14 = vld [vmem:[%s3028_s6] sm:$0x1] }
 0xf9b   :  { %v1001_v15 = vmul.f32 %v1000_v14, %v2649_v11 }
 0xf9c   :  { %2529 = vtanh.f32 %v789_v16 }
 0xfa6   :  { %v2530_v21 = vpop.eup %2529 }
 0xfa7   :  { %792 = vrot.lane.b32.xlu0 %v2530_v21, %s2575_s3 }
0x1019   :  { %v793_v17 = vpop.permute.xlu0 %792 }
0x101a   :  { %v795_v39 = vmul.f32 %v793_v17, %v778_v12 }
0x101c   :  { %799 = vrot.lane.b32.xlu1 %v795_v39, %s2576_s13 }
0x108e   :  { %v800_v19 = vpop.permute.xlu1 %799 }
0x108f   :  { %2259 = vmatmul.mubr.msk.f32.vlgmr.msra.gmra.mrb[14].mxu0 %vm211_vm5, %v800_v19 }
0x1090   :  { %2280 = vmatprep.mubr.msk.f32.mxu0 %vm2572_vm1, %v2573_v4 }
0x1162   :  { %v869_v20 = vpop.f32.mrb[14].mxu0 }
0x1163   :  { %v873_v22 = vadd.f32 %v869_v20, %v2725_v45  ;;  %v2260_v23 = vpop.f32.mrb[15].mxu0 }
0x1165   :  { %2531 = vtanh.f32 %v873_v22 }
0x116f   :  { %v2532_v24 = vpop.eup %2531 }
0x1170   :  { %879 = vrot.lane.b32.xlu0 %v2532_v24, %s2575_s3  ;;  %v875_v25 = vmul.f32 0.5, %v2532_v24 }
0x1172   :  { %v876_v27 = vadd.f32 0.5, %v875_v25 }
0x1174   :  { %v877_v31 = vmul.f32 %v876_v27, %v789_v16  ;;  %v1006_v16 = vrot.slane %v1001_v15, %v69_v29 }
0x11e2   :  { %v880_v28 = vpop.permute.xlu0 %879 }
0x11e3   :  { %v882_v30 = vmul.f32 %v880_v28, %v876_v27 }
0x11e5   :  { %884 = vrot.lane.b32.xlu1 %v882_v30, %s2576_s13 }
0x1257   :  { %v885_v32 = vpop.permute.xlu1 %884 }
0x1258   :  { %v887_v33 = vadd.f32 %v885_v32, %v877_v31 }
0x125a   :  { %2533 = vtanh.f32 %v887_v33 }
0x1264   :  { %v2534_v34 = vpop.eup %2533 }
0x1265   :  { %890 = vrot.lane.b32.xlu0 %v2534_v34, %s2575_s3 }
0x12d7   :  { %v891_v36 = vpop.permute.xlu0 %890 }
0x12d8   :  { %v893_v45 = vmul.f32 %v891_v36, %v876_v27 }
0x12da   :  { %897 = vrot.lane.b32.xlu1 %v893_v45, %s2576_s13 }
0x134c   :  { %v898_v37 = vpop.permute.xlu1 %897 }
0x134d   :  { %2270 = vmatmul.mubr.msk.f32.vlgmr.msra.gmra.mrb[6].mxu1 %vm211_vm5, %v898_v37 }
0x134e   :  { %2291 = vmatprep.mubr.msk.f32.mxu1 %vm2572_vm1, %v2573_v4  ;;  %2447 = vmatpush3.bf16.msra.mxu1 %v2836_v5 }
0x134f   :  { %2448 = vmatprep.subr.bf16.mxu1 %v2571_v2 }
0x1352   :  { %2450 = vmatpush3.bf16.msra.mxu1 %v2840_v7 }
0x1353   :  { %2457 = vmatprep.subr.bf16.mxu1 %v2571_v2 }
0x1355   :  { %2292 = vmatmul.mubr.f32.vlgmr.msra.gmra.mrb[8].mxu1 %v2573_v4 }
0x1356   :  { %2459 = vmatpush3.bf16.msra.mxu1 %v2836_v5  ;;  %2313 = vmatprep.mubr.msk.f32.mxu1 %vm2572_vm1, %v2573_v4 }
0x1357   :  { %2460 = vmatprep.subr.bf16.mxu1 %v2571_v2 }
0x135a   :  { %2462 = vmatpush3.bf16.msra.mxu1 %v2840_v7 }
0x135b   :  { %2469 = vmatprep.subr.bf16.mxu1 %v2571_v2 }
0x1420   :  { %v967_v38 = vpop.f32.mrb[6].mxu1 }
0x1421   :  { %v971_v40 = vadd.f32 %v967_v38, %v2723_v43  ;;  %v2271_v42 = vpop.f32.mrb[7].mxu1  ;;  %v993_v43 = vld [vmem:[%s3026_s4 + $0x8] sm:$0xff] }
0x1422   :  { %v997_v55 = vmul.f32 %v993_v43, %v2649_v11 }
0x1423   :  { %2535 = vtanh.f32 %v971_v40 }
0x1424   :  { %v2440_v1 = vpack.c.bf16 %v997_v55, %v996_v54 }
0x1426   :  { %2441 = vmatpush3.bf16.msra.mxu0 %v2440_v1 }
0x1427   :  { %2442 = vmatprep.subr.bf16.mxu0 %v2571_v2 }
0x1428   :  { %v1149_v18 = vpop.f32.mrb[8].mxu1 }
0x1429   :  { %v2293_v13 = vpop.f32.mrb[9].mxu1 }
0x142a   :  { %2444 = vmatpush3.bf16.msra.mxu0 %v2443_v6 }
0x142b   :  { %2451 = vmatprep.subr.bf16.mxu0 %v2571_v2 }
0x142d   :  { %v2536_v44 = vpop.eup %2535 }
0x142e   :  { %977 = vrot.lane.b32.xlu0 %v2536_v44, %s2575_s3  ;;  %v973_v46 = vmul.f32 0.5, %v2536_v44 }
0x1430   :  { %v974_v47 = vadd.f32 0.5, %v973_v46 }
0x1432   :  { %v975_v50 = vmul.f32 %v974_v47, %v887_v33 }
0x14a0   :  { %v978_v48 = vpop.permute.xlu0 %977 }
0x14a1   :  { %v980_v49 = vmul.f32 %v978_v48, %v974_v47 }
0x14a3   :  { %982 = vrot.lane.b32.xlu1 %v980_v49, %s2576_s13 }
0x1515   :  { %v983_v51 = vpop.permute.xlu1 %982 }
0x1516   :  { %v985_v52 = vadd.f32 %v983_v51, %v975_v50 }
0x1518   :  { %2537 = vtanh.f32 %v985_v52 }
0x1522   :  { %v2538_v8 = vpop.eup %2537 }
0x1523   :  { %988 = vrot.lane.b32.xlu0 %v2538_v8, %s2575_s3 }
0x1595   :  { %v989_v9 = vpop.permute.xlu0 %988 }
0x1596   :  { %v991_v10 = vmul.f32 %v989_v9, %v974_v47 }
0x1598   :  { %1009 = vrot.lane.b32.xlu1 %v991_v10, %s2576_s13 }
0x160a   :  { %v1010_v12 = vpop.permute.xlu1 %1009 }
0x160b   :  { %2281 = vmatmul.mubr.msk.f32.vlgmr.msra.gmra.mrb[16].mxu0 %vm211_vm5, %v1010_v12 }
0x160c   :  { %2453 = vmatpush3.bf16.msra.mxu0 %v2836_v5  ;;  %2302 = vmatprep.mubr.msk.f32.mxu0 %vm2572_vm1, %v2573_v4 }
0x160d   :  { %2454 = vmatprep.subr.bf16.mxu0 %v2571_v2 }
0x1610   :  { %2456 = vmatpush3.bf16.msra.mxu0 %v2840_v7 }
0x1611   :  { %2463 = vmatprep.subr.bf16.mxu0 %v2571_v2 }
0x16de   :  { %v1079_v21 = vpop.f32.mrb[16].mxu0 }
0x16df   :  { %v2868_v17 = vadd.f32 %v1079_v21, %v1006_v16  ;;  %v2282_v39 = vpop.f32.mrb[17].mxu0 }
0x16e1   :  { %v1153_v19 = vadd.f32 %v1149_v18, %v2868_v17 }
0x16e3   :  { %2539 = vtanh.f32 %v1153_v19 }
0x16ed   :  { %v2540_v20 = vpop.eup %2539 }
0x16ee   :  { %1159 = vrot.lane.b32.xlu0 %v2540_v20, %s2575_s3  ;;  %v1155_v22 = vmul.f32 0.5, %v2540_v20 }
0x16f0   :  { %v1156_v23 = vadd.f32 0.5, %v1155_v22 }
0x16f2   :  { %v1157_v11 = vmul.f32 0.0, %v1156_v23 }
0x1760   :  { %v1160_v24 = vpop.permute.xlu0 %1159 }
0x1761   :  { %v1162_v25 = vmul.f32 %v1160_v24, %v1156_v23 }
0x1763   :  { %1164 = vrot.lane.b32.xlu1 %v1162_v25, %s2576_s13 }
0x17d5   :  { %v1165_v27 = vpop.permute.xlu1 %1164 }
0x17d6   :  { %v1167_v26 = vadd.f32 %v1165_v27, %v1157_v11 }
0x17d8   :  { %2541 = vtanh.f32 %v1167_v26 }
0x17e2   :  { %v2542_v29 = vpop.eup %2541 }
0x17e3   :  { %1170 = vrot.lane.b32.xlu0 %v2542_v29, %s2575_s3 }
0x1855   :  { %v1171_v28 = vpop.permute.xlu0 %1170 }
0x1856   :  { %v1173_v30 = vmul.f32 %v1171_v28, %v1156_v23 }
0x1858   :  { %1175 = vrot.lane.b32.xlu1 %v1173_v30, %s2576_s13 }
0x18ca   :  { %v1176_v31 = vpop.permute.xlu1 %1175 }
0x18cb   :  { %1178 = vst.msk [vmem:[#allocation3] sm:$0xff] %vm211_vm5, %v1176_v31  ;;  %2303 = vmatmul.mubr.msk.f32.vlgmr.msra.gmra.mrb[18].mxu0 %vm211_vm5, %v1176_v31 }
0x18cc   :  { %2465 = vmatpush3.bf16.msra.mxu0 %v2836_v5  ;;  %2324 = vmatprep.mubr.msk.f32.mxu0 %vm2572_vm1, %v2573_v4 }
0x18cd   :  { %2466 = vmatprep.subr.bf16.mxu0 %v2571_v2 }
0x18d0   :  { %2468 = vmatpush3.bf16.msra.mxu0 %v2840_v7 }
0x18d1   :  { %2475 = vmatprep.subr.bf16.mxu0 %v2571_v2 }
0x199e   :  { %v1247_v32 = vpop.f32.mrb[18].mxu0 }
0x199f   :  { %v1251_v33 = vadd.f32 %v1247_v32, %v2868_v17  ;;  %v2304_v34 = vpop.f32.mrb[19].mxu0 }
0x19a1   :  { %2543 = vtanh.f32 %v1251_v33 }
0x19ab   :  { %v2544_v36 = vpop.eup %2543 }
0x19ac   :  { %1257 = vrot.lane.b32.xlu0 %v2544_v36, %s2575_s3  ;;  %v1253_v45 = vmul.f32 0.5, %v2544_v36 }
0x19ae   :  { %v1254_v37 = vadd.f32 0.5, %v1253_v45 }
0x19b0   :  { %v1255_v42 = vmul.f32 %v1254_v37, %v1167_v26 }
0x1a1e   :  { %v1258_v38 = vpop.permute.xlu0 %1257 }
0x1a1f   :  { %v1260_v40 = vmul.f32 %v1258_v38, %v1254_v37 }
0x1a21   :  { %1262 = vrot.lane.b32.xlu1 %v1260_v40, %s2576_s13 }
0x1a93   :  { %v1263_v44 = vpop.permute.xlu1 %1262 }
0x1a94   :  { %v1265_v46 = vadd.f32 %v1263_v44, %v1255_v42 }
0x1a96   :  { %2545 = vtanh.f32 %v1265_v46 }
0x1aa0   :  { %v2546_v47 = vpop.eup %2545 }
0x1aa1   :  { %1268 = vrot.lane.b32.xlu0 %v2546_v47, %s2575_s3 }
0x1b13   :  { %v1269_v48 = vpop.permute.xlu0 %1268 }
0x1b14   :  { %v1271_v49 = vmul.f32 %v1269_v48, %v1254_v37 }
0x1b16   :  { %1273 = vrot.lane.b32.xlu1 %v1271_v49, %s2576_s13 }
0x1b88   :  { %v1274_v50 = vpop.permute.xlu1 %1273 }
0x1b89   :  { %1277 = vst.msk [vmem:[#allocation3 + $0x8] sm:$0xff] %vm211_vm5, %v1274_v50  ;;  %2314 = vmatmul.mubr.msk.f32.vlgmr.msra.gmra.mrb[10].mxu1 %vm211_vm5, %v1274_v50  ;;  %v1882_v50 = vld [vmem:[%s3029_s7 + $0x10] sm:$0xff] }
0x1b8a   :  { %2471 = vmatpush3.bf16.msra.mxu1 %v2836_v5  ;;  %2335 = vmatprep.mubr.msk.f32.mxu1 %vm2572_vm1, %v2573_v4 }
0x1b8b   :  { %2472 = vmatprep.subr.bf16.mxu1 %v2571_v2 }
0x1b8e   :  { %2474 = vmatpush3.bf16.msra.mxu1 %v2840_v7 }
0x1b8f   :  { %2481 = vmatprep.subr.bf16.mxu1 %v2571_v2 }
0x1c5c   :  { %v1346_v51 = vpop.f32.mrb[10].mxu1 }
0x1c5d   :  { %v1350_v52 = vadd.f32 %v1346_v51, %v2868_v17  ;;  %v2315_v35 = vpop.f32.mrb[11].mxu1  ;;  %v1883_v51 = vld [vmem:[%s3029_s7 + $0x18] sm:$0xff] }
0x1c5f   :  { %2547 = vtanh.f32 %v1350_v52  ;;  %v2497_v52 = vpack.c.bf16 %v1883_v51, %v1882_v50 }
0x1c69   :  { %v2548_v43 = vpop.eup %2547 }
0x1c6a   :  { %1356 = vrot.lane.b32.xlu0 %v2548_v43, %s2575_s3  ;;  %v1352_v53 = vmul.f32 0.5, %v2548_v43  ;;  %v1872_v43 = vld [vmem:[#allocation3] sm:$0xff] }
0x1c6c   :  { %v1353_v54 = vadd.f32 0.5, %v1352_v53  ;;  %v1873_v53 = vld [vmem:[#allocation3 + $0x8] sm:$0xff] }
0x1c6e   :  { %v1354_v57 = vmul.f32 %v1353_v54, %v1265_v46 }
0x1cdc   :  { %v1357_v55 = vpop.permute.xlu0 %1356 }
0x1cdd   :  { %v1359_v56 = vmul.f32 %v1357_v55, %v1353_v54 }
0x1cdf   :  { %1361 = vrot.lane.b32.xlu1 %v1359_v56, %s2576_s13 }
0x1d51   :  { %v1362_v58 = vpop.permute.xlu1 %1361 }
0x1d52   :  { %v1364_v59 = vadd.f32 %v1362_v58, %v1354_v57 }
0x1d54   :  { %2549 = vtanh.f32 %v1364_v59 }
0x1d5e   :  { %v2550_v60 = vpop.eup %2549 }
0x1d5f   :  { %1367 = vrot.lane.b32.xlu0 %v2550_v60, %s2575_s3 }
0x1dd1   :  { %v1368_v61 = vpop.permute.xlu0 %1367 }
0x1dd2   :  { %v1370_v62 = vmul.f32 %v1368_v61, %v1353_v54  ;;  %v2965_v61 = vld [vmem:[%s3030_s8] ss:$0 sm:$0xff] }
0x1dd4   :  { %1372 = vrot.lane.b32.xlu1 %v1370_v62, %s2576_s13 }
0x1e46   :  { %v1373_v63 = vpop.permute.xlu1 %1372 }
0x1e47   :  { %1376 = vst.msk [vmem:[#allocation3 + $0x10] sm:$0xff] %vm211_vm5, %v1373_v63  ;;  %2325 = vmatmul.mubr.msk.f32.vlgmr.msra.gmra.mrb[20].mxu0 %vm211_vm5, %v1373_v63 }
0x1e48   :  { %2477 = vmatpush3.bf16.msra.mxu0 %v2836_v5  ;;  %2346 = vmatprep.mubr.msk.f32.mxu0 %vm2572_vm1, %v2573_v4 }
0x1e49   :  { %2478 = vmatprep.subr.bf16.mxu0 %v2571_v2 }
0x1e4c   :  { %2480 = vmatpush3.bf16.msra.mxu0 %v2840_v7 }
0x1e4d   :  { %2487 = vmatprep.subr.bf16.mxu0 %v2571_v2 }
0x1e4e   :  { %v1874_v54 = vld [vmem:[#allocation3 + $0x10] sm:$0xff] }
0x1f1a   :  { %v1445_v0 = vpop.f32.mrb[20].mxu0 }
0x1f1b   :  { %v1449_v1 = vadd.f32 %v1445_v0, %v2868_v17  ;;  %v2326_v3 = vpop.f32.mrb[21].mxu0 }
0x1f1d   :  { %2551 = vtanh.f32 %v1449_v1 }
0x1f27   :  { %v2552_v41 = vpop.eup %2551 }
0x1f28   :  { %1455 = vrot.lane.b32.xlu0 %v2552_v41, %s2575_s3  ;;  %v1451_v6 = vmul.f32 0.5, %v2552_v41 }
0x1f2a   :  { %v1452_v8 = vadd.f32 0.5, %v1451_v6 }
0x1f2c   :  { %v1453_v12 = vmul.f32 %v1452_v8, %v1364_v59 }
0x1f9a   :  { %v1456_v9 = vpop.permute.xlu0 %1455 }
0x1f9b   :  { %v1458_v10 = vmul.f32 %v1456_v9, %v1452_v8 }
0x1f9d   :  { %1460 = vrot.lane.b32.xlu1 %v1458_v10, %s2576_s13 }
0x200f   :  { %v1461_v18 = vpop.permute.xlu1 %1460 }
0x2010   :  { %v1463_v13 = vadd.f32 %v1461_v18, %v1453_v12 }
0x2012   :  { %2553 = vtanh.f32 %v1463_v13 }
0x201c   :  { %v2554_v14 = vpop.eup %2553 }
0x201d   :  { %1466 = vrot.lane.b32.xlu0 %v2554_v14, %s2575_s3 }
0x208f   :  { %v1467_v15 = vpop.permute.xlu0 %1466 }
0x2090   :  { %v1469_v16 = vmul.f32 %v1467_v15, %v1452_v8 }
0x2092   :  { %1471 = vrot.lane.b32.xlu1 %v1469_v16, %s2576_s13 }
0x2104   :  { %v1472_v21 = vpop.permute.xlu1 %1471 }
0x2105   :  { %1475 = vst.msk [vmem:[#allocation3 + $0x18] sm:$0xff] %vm211_vm5, %v1472_v21  ;;  %2336 = vmatmul.mubr.msk.f32.vlgmr.msra.gmra.mrb[12].mxu1 %vm211_vm5, %v1472_v21 }
0x2106   :  { %2483 = vmatpush3.bf16.msra.mxu1 %v2836_v5  ;;  %2357 = vmatprep.mubr.msk.f32.mxu1 %vm2572_vm1, %v2573_v4 }
0x2107   :  { %2484 = vmatprep.subr.bf16.mxu1 %v2571_v2 }
0x210a   :  { %2486 = vmatpush3.bf16.msra.mxu1 %v2840_v7 }
0x210c   :  { %v1875_v55 = vld [vmem:[#allocation3 + $0x18] sm:$0xff] }
0x21d8   :  { %v1544_v39 = vpop.f32.mrb[12].mxu1 }
0x21d9   :  { %v1548_v19 = vadd.f32 %v1544_v39, %v2868_v17  ;;  %v2337_v20 = vpop.f32.mrb[13].mxu1 }
0x21db   :  { %2555 = vtanh.f32 %v1548_v19 }
0x21e5   :  { %v2556_v22 = vpop.eup %2555 }
0x21e6   :  { %1554 = vrot.lane.b32.xlu0 %v2556_v22, %s2575_s3  ;;  %v1550_v23 = vmul.f32 0.5, %v2556_v22 }
0x21e8   :  { %v1551_v24 = vadd.f32 0.5, %v1550_v23 }
0x21ea   :  { %v1552_v27 = vmul.f32 %v1551_v24, %v1463_v13 }
0x2258   :  { %v1555_v25 = vpop.permute.xlu0 %1554 }
0x2259   :  { %v1557_v11 = vmul.f32 %v1555_v25, %v1551_v24 }
0x225b   :  { %1559 = vrot.lane.b32.xlu1 %v1557_v11, %s2576_s13 }
0x22cd   :  { %v1560_v26 = vpop.permute.xlu1 %1559 }
0x22ce   :  { %v1562_v29 = vadd.f32 %v1560_v26, %v1552_v27 }
0x22d0   :  { %2557 = vtanh.f32 %v1562_v29 }
0x22da   :  { %v2558_v28 = vpop.eup %2557 }
0x22db   :  { %1565 = vrot.lane.b32.xlu0 %v2558_v28, %s2575_s3 }
0x234d   :  { %v1566_v30 = vpop.permute.xlu0 %1565 }
0x234e   :  { %v1568_v31 = vmul.f32 %v1566_v30, %v1551_v24 }
0x2350   :  { %1570 = vrot.lane.b32.xlu1 %v1568_v31, %s2576_s13 }
0x23c2   :  { %v1571_v32 = vpop.permute.xlu1 %1570 }
0x23c3   :  { %1574 = vst.msk [vmem:[#allocation3 + $0x20] sm:$0xff] %vm211_vm5, %v1571_v32  ;;  %2347 = vmatmul.mubr.msk.f32.vlgmr.msra.gmra.mrb[22].mxu0 %vm211_vm5, %v1571_v32 }
0x23c4   :  { %2489 = vmatpush3.bf16.msra.mxu0 %v2836_v5  ;;  %2368 = vmatprep.mubr.msk.f32.mxu0 %vm2572_vm1, %v2573_v4 }
0x23c5   :  { %2490 = vmatprep.subr.bf16.mxu0 %v2571_v2  ;;  %v1880_v2 = vld [vmem:[%s3029_s7] sm:$0xff] }
0x23c8   :  { %2492 = vmatpush3.bf16.msra.mxu0 %v2840_v7  ;;  %v1881_v7 = vld [vmem:[%s3029_s7 + $0x8] sm:$0xff] }
0x23c9   :  { %v2493_v46 = vpack.c.bf16 %v1881_v7, %v1880_v2 }
0x23ca   :  { %v1876_v56 = vld [vmem:[#allocation3 + $0x20] sm:$0xff] }
0x23cb   :  { %2494 = vmatprep.subr.bf16.mxu1 %v2493_v46 }
0x2496   :  { %v1643_v33 = vpop.f32.mrb[22].mxu0 }
0x2497   :  { %v1647_v34 = vadd.f32 %v1643_v33, %v2868_v17  ;;  %v2348_v36 = vpop.f32.mrb[23].mxu0 }
0x2499   :  { %2559 = vtanh.f32 %v1647_v34 }
0x24a3   :  { %v2560_v45 = vpop.eup %2559 }
0x24a4   :  { %1653 = vrot.lane.b32.xlu0 %v2560_v45, %s2575_s3  ;;  %v1649_v37 = vmul.f32 0.5, %v2560_v45 }
0x24a6   :  { %v1650_v38 = vadd.f32 0.5, %v1649_v37 }
0x24a8   :  { %v1651_v5 = vmul.f32 %v1650_v38, %v1562_v29 }
0x2516   :  { %v1654_v40 = vpop.permute.xlu0 %1653 }
0x2517   :  { %v1656_v42 = vmul.f32 %v1654_v40, %v1650_v38 }
0x2519   :  { %1658 = vrot.lane.b32.xlu1 %v1656_v42, %s2576_s13 }
0x258b   :  { %v1659_v4 = vpop.permute.xlu1 %1658 }
0x258c   :  { %v2936_v44 = vadd.f32 %v1659_v4, %v1651_v5 }
0x258e   :  { %2561 = vtanh.f32 %v2936_v44 }
0x2598   :  { %v2562_v47 = vpop.eup %2561 }
0x2599   :  { %1664 = vrot.lane.b32.xlu0 %v2562_v47, %s2575_s3 }
0x260b   :  { %v1665_v48 = vpop.permute.xlu0 %1664 }
0x260c   :  { %v1667_v49 = vmul.f32 %v1665_v48, %v1650_v38 }
0x260e   :  { %1669 = vrot.lane.b32.xlu1 %v1667_v49, %s2576_s13 }
0x2680   :  { %v1670_v35 = vpop.permute.xlu1 %1669 }
0x2681   :  { %1673 = vst.msk [vmem:[#allocation3 + $0x28] sm:$0xff] %vm211_vm5, %v1670_v35  ;;  %2358 = vmatmul.mubr.msk.f32.vlgmr.msra.gmra.mrb[14].mxu1 %vm211_vm5, %v1670_v35 }
0x2682   :  { %2496 = vmatpush3.bf16.msra.mxu1 %v2493_v46  ;;  %2379 = vmatprep.mubr.msk.f32.mxu1 %vm211_vm5, %v1872_v43 }
0x2683   :  { %2498 = vmatprep.subr.bf16.mxu1 %v2497_v52 }
0x2686   :  { %2500 = vmatpush3.bf16.msra.mxu1 %v2497_v52 }
0x2688   :  { %v1877_v57 = vld [vmem:[#allocation3 + $0x28] sm:$0xff] }
0x2689   :  { %2380 = vmatmul.mubr.msk.f32.vlgmr.msra.gmra.mrb[16].mxu1 %vm211_vm5, %v1873_v53 }
0x268a   :  { %2382 = vmatprep.mubr.msk.f32.mxu1 %vm211_vm5, %v1874_v54 }
0x268d   :  { %2383 = vmatmul.mubr.msk.f32.gmra.mrb[18].mxu1 %vm211_vm5, %v1875_v55 }
0x268e   :  { %2385 = vmatprep.mubr.msk.f32.mxu1 %vm211_vm5, %v1876_v56 }
0x2691   :  { %2386 = vmatmul.mubr.msk.f32.gmra.mrb[20].mxu1 %vm211_vm5, %v1877_v57 }
0x2754   :  { %v1742_v58 = vpop.f32.mrb[14].mxu1 }
0x2755   :  { %v1746_v59 = vadd.f32 %v1742_v58, %v2868_v17  ;;  %v2359_v60 = vpop.f32.mrb[15].mxu1 }
0x2757   :  { %2563 = vtanh.f32 %v1746_v59 }
0x275c   :  { %v2381_v62 = vpop.f32.mrb[16].mxu1 }
0x275d   :  { %v1987_v63 = vadd.f32 %v2381_v62, %v2965_v61  ;;  %v1981_v0 = vpop.f32.mrb[17].mxu1 }
0x275e   :  { %v1982_v1 = vadd.f32 %v2965_v61, %v1981_v0 }
0x275f   :  { %2021 = vst.msk [vmem:[%s3031_s9 + $0x8] sm:$0xff] %vm72_vm0, %v1987_v63 }
0x2760   :  { %2020 = vst.msk [vmem:[%s3031_s9] sm:$0xff] %vm72_vm0, %v1982_v1  ;;  %v2384_v3 = vpop.f32.mrb[18].mxu1 }
0x2761   :  { %v2564_v41 = vpop.eup %2563  ;;  %v1997_v6 = vadd.f32 %v2384_v3, %v2965_v61  ;;  %v1991_v8 = vpop.f32.mrb[19].mxu1 }
0x2762   :  { %v1992_v9 = vadd.f32 %v2965_v61, %v1991_v8  ;;  %1752 = vrot.lane.b32.xlu0 %v2564_v41, %s2575_s3  ;;  %v1748_v14 = vmul.f32 0.5, %v2564_v41 }
0x2763   :  { %2023 = vst.msk [vmem:[%s3031_s9 + $0x18] sm:$0xff] %vm72_vm0, %v1997_v6 }
0x2764   :  { %2022 = vst.msk [vmem:[%s3031_s9 + $0x10] sm:$0xff] %vm72_vm0, %v1992_v9  ;;  %v2387_v10 = vpop.f32.mrb[20].mxu1  ;;  %v1749_v15 = vadd.f32 0.5, %v1748_v14 }
0x2765   :  { %v2007_v12 = vadd.f32 %v2387_v10, %v2965_v61  ;;  %v2001_v18 = vpop.f32.mrb[21].mxu1 }
0x2766   :  { %v2002_v13 = vadd.f32 %v2965_v61, %v2001_v18  ;;  %v1750_v39 = vmul.f32 %v1749_v15, %v2936_v44 }
0x2767   :  { %2025 = vst.msk [vmem:[%s3031_s9 + $0x28] sm:$0xff] %vm72_vm0, %v2007_v12 }
0x2768   :  { %2024 = vst.msk [vmem:[%s3031_s9 + $0x20] sm:$0xff] %vm72_vm0, %v2002_v13 }
0x27d4   :  { %v1753_v16 = vpop.permute.xlu0 %1752 }
0x27d5   :  { %v1755_v21 = vmul.f32 %v1753_v16, %v1749_v15 }
0x27d7   :  { %1757 = vrot.lane.b32.xlu1 %v1755_v21, %s2576_s13 }
0x2849   :  { %v1758_v19 = vpop.permute.xlu1 %1757 }
0x284a   :  { %v1760_v20 = vadd.f32 %v1758_v19, %v1750_v39 }
0x284c   :  { %2565 = vtanh.f32 %v1760_v20 }
0x2856   :  { %v2566_v22 = vpop.eup %2565 }
0x2857   :  { %1763 = vrot.lane.b32.xlu0 %v2566_v22, %s2575_s3 }
0x28c9   :  { %v1764_v23 = vpop.permute.xlu0 %1763 }
0x28ca   :  { %v1766_v24 = vmul.f32 %v1764_v23, %v1749_v15 }
0x28cc   :  { %1768 = vrot.lane.b32.xlu1 %v1766_v24, %s2576_s13 }
0x293e   :  { %v1769_v25 = vpop.permute.xlu1 %1768 }
0x293f   :  { %1772 = vst.msk [vmem:[#allocation3 + $0x30] sm:$0xff] %vm211_vm5, %v1769_v25  ;;  %2369 = vmatmul.mubr.msk.f32.vlgmr.msra.gmra.mrb[24].mxu0 %vm211_vm5, %v1769_v25 }
0x2946   :  { %v1878_v11 = vld [vmem:[#allocation3 + $0x30] sm:$0xff] }
0x2947   :  { %2388 = vmatprep.mubr.msk.f32.mxu1 %vm211_vm5, %v1878_v11 }
0x2a12   :  { %v1841_v27 = vpop.f32.mrb[24].mxu0 }
0x2a13   :  { %v1845_v26 = vadd.f32 %v1841_v27, %v2868_v17  ;;  %v2370_v29 = vpop.f32.mrb[25].mxu0 }
0x2a15   :  { %2567 = vtanh.f32 %v1845_v26 }
0x2a1f   :  { %v2568_v28 = vpop.eup %2567 }
0x2a20   :  { %1851 = vrot.lane.b32.xlu0 %v2568_v28, %s2575_s3  ;;  %v1847_v30 = vmul.f32 0.5, %v2568_v28 }
0x2a22   :  { %v1848_v31 = vadd.f32 0.5, %v1847_v30 }
0x2a24   :  { %v1849_v34 = vmul.f32 %v1848_v31, %v1760_v20 }
0x2a92   :  { %v1852_v32 = vpop.permute.xlu0 %1851 }
0x2a93   :  { %v1854_v33 = vmul.f32 %v1852_v32, %v1848_v31 }
0x2a95   :  { %1856 = vrot.lane.b32.xlu1 %v1854_v33, %s2576_s13 }
0x2b07   :  { %v1857_v36 = vpop.permute.xlu1 %1856 }
0x2b08   :  { %v1859_v45 = vadd.f32 %v1857_v36, %v1849_v34 }
0x2b0a   :  { %2569 = vtanh.f32 %v1859_v45 }
0x2b14   :  { %v2570_v37 = vpop.eup %2569 }
0x2b15   :  { %1862 = vrot.lane.b32.xlu0 %v2570_v37, %s2575_s3 }
0x2b87   :  { %v1863_v38 = vpop.permute.xlu0 %1862 }
0x2b88   :  { %v1865_v17 = vmul.f32 %v1863_v38, %v1848_v31 }
0x2b8a   :  { %1867 = vrot.lane.b32.xlu1 %v1865_v17, %s2576_s13 }
0x2bfc   :  { %v1868_v40 = vpop.permute.xlu1 %1867 }
0x2bfd   :  { %1871 = vst.msk [vmem:[#allocation3 + $0x38] sm:$0xff] %vm211_vm5, %v1868_v40 }
0x2c04   :  { %v1879_v42 = vld [vmem:[#allocation3 + $0x38] sm:$0xff] }
0x2c05   :  { %2389 = vmatmul.mubr.msk.f32.gmra.mrb[22].mxu1 %vm211_vm5, %v1879_v42 }
0x2cd8   :  { %v2390_v5 = vpop.f32.mrb[22].mxu1 }
0x2cd9   :  { %v2017_v4 = vadd.f32 %v2390_v5, %v2965_v61  ;;  %v2011_v44 = vpop.f32.mrb[23].mxu1 }
0x2cda   :  { %v2012_v2 = vadd.f32 %v2965_v61, %v2011_v44 }
0x2cdb   :  { %2027 = vst.msk [vmem:[%s3031_s9 + $0x38] sm:$0xff] %vm72_vm0, %v2017_v4 }
0x2cdc   :  { %2026 = vst.msk [vmem:[%s3031_s9 + $0x30] sm:$0xff] %vm72_vm0, %v2012_v2 }

</bundles_post_ra>
